<compile_context>
chip_gen: v7x
topology: tpu7x:2x2x1
jax: 0.10.0
libtpu: 0.0.40
codegen_flags: <defaults>
</compile_context>

<pallas_src>
import functools

import jax
import jax.numpy as jnp
import numpy as np
from jax.experimental import pallas as pl
from jax.experimental.pallas import tpu as pltpu

NEG_BIG = -1e30  # stand-in for -inf in the masked segment-max


def net_kernel(xt_ref, wred_ref, bred_ref, adjt_ref, wggc_ref,
               wih_ref, whh_ref, brz_ref, bin_ref, bhn_ref,
               wpool_ref, bpool_ref, seg_ref, out_ref, *, n_steps):
    f32 = jnp.float32
    hidden = wred_ref.shape[0]
    n_nodes = xt_ref.shape[1]

    # ---- reduce: Linear(annotation_size, hidden), transposed: h [H, N] ----
    h = jnp.dot(wred_ref[...], xt_ref[...],
                preferred_element_type=f32) + bred_ref[...]

    adj_t = adjt_ref[...]              # [N, N] bf16, adj_t[j, i] = #edges j -> i
    wih = wih_ref[...]                 # [3H, H] fused (r, z, n)
    whh = whh_ref[...]                 # [3H, H]

    # Hoist bias broadcasts out of the unrolled step loop (no CSE in JAX).
    b_rz = jnp.broadcast_to(brz_ref[...], (2 * hidden, n_nodes))   # bih+bhh (r,z)
    b_in = jnp.broadcast_to(bin_ref[...], (hidden, n_nodes))       # bih (n)
    b_hn = jnp.broadcast_to(bhn_ref[...], (hidden, n_nodes))       # bhh (n), scaled by r

    # ---- GatedGraphConv: n_steps of (matmul, aggregate, GRUCell) ----
    # n_steps is small (<=8); static unroll keeps LLO scheduling tight.
    for t in range(n_steps):
        m = jnp.dot(wggc_ref[t], h, preferred_element_type=f32)          # [H, N]
        m = jnp.dot(m.astype(jnp.bfloat16), adj_t,
                    preferred_element_type=f32)                          # scatter-add over edges

        gi = jnp.dot(wih, m, preferred_element_type=f32)                 # [3H, N]
        gh = jnp.dot(whh, h, preferred_element_type=f32)                 # [3H, N]

        rz = jax.nn.sigmoid(gi[:2 * hidden] + gh[:2 * hidden] + b_rz)    # [2H, N]
        r = rz[:hidden]
        z = rz[hidden:]
        n = jnp.tanh(gi[2 * hidden:] + b_in + r * (gh[2 * hidden:] + b_hn))
        h = (1.0 - z) * n + z * h

    # ---- GlobalAttention pooling (fused gate+feat projection) ----
    seg = seg_ref[...]                                                   # [G, N] one-hot
    pool = jnp.dot(wpool_ref[...], h,
                   preferred_element_type=f32) + bpool_ref[...]          # [3, N]
    gate = pool[0:1, :]                                                  # [1, N]
    feat = pool[1:3, :]                                                  # [2, N]

    masked = jnp.where(seg > 0, gate, NEG_BIG)                           # [G, N]
    gmax = jnp.max(masked, axis=1, keepdims=True)                        # [G, 1]
    node_max = jnp.sum(seg * gmax, axis=0, keepdims=True)                # [1, N]
    e = jnp.exp(gate - node_max)                                         # [1, N]
    gsum = jnp.sum(seg * e, axis=1, keepdims=True)                       # [G, 1]
    node_sum = jnp.sum(seg * gsum, axis=0, keepdims=True)                # [1, N]
    alpha = e * pl.reciprocal(node_sum, approx=True)                     # segment softmax
    weighted = alpha * feat                                              # [2, N]
    # pooled[g, c] = sum_n seg[g, n] * weighted[c, n]   (A @ B.T form)
    pooled = jax.lax.dot_general(seg, weighted,
                                 dimension_numbers=(((1,), (1,)), ((), ())),
                                 preferred_element_type=f32)             # [G, 2]

    # ---- log_softmax(dim=1) ----
    pmax = jnp.max(pooled, axis=1, keepdims=True)
    shifted = pooled - pmax
    lse = jnp.log(jnp.sum(jnp.exp(shifted), axis=1, keepdims=True))
    out_ref[...] = shifted - lse


def net_forward(x, edge_index, batch, params, *, n_steps, num_graphs):
    """Glue: pack/transpose weights, build dense adjacency + segment one-hot,
    then one Pallas call in the transposed [H, N] layout."""
    n_nodes, _ = x.shape
    hidden = params["wred"].shape[1]
    src, dst = edge_index[0], edge_index[1]

    # adj_t[j, i] = number of edges j -> i (source_to_target flow, 'add' aggr).
    # bf16 is exact for integer edge multiplicities <= 256.
    adj_t = jnp.zeros((n_nodes, n_nodes), jnp.float32).at[src, dst].add(1.0)
    adj_t = adj_t.astype(jnp.bfloat16)

    seg = (batch[None, :] == jnp.arange(num_graphs)[:, None]).astype(jnp.float32)  # [G, N]

    # Transposed / fused parameter packing.
    x_t = x.T                                                    # [A, N]
    wred_t = params["wred"].T                                    # [H, A]
    bred_c = params["bred"].reshape(hidden, 1)                   # [H, 1]
    wggc_t = jnp.transpose(params["wggc"], (0, 2, 1))            # [T, H, H]
    wih_f = params["wih"].transpose(0, 2, 1).reshape(3 * hidden, hidden)   # [3H, H] (r,z,n)
    whh_f = params["whh"].transpose(0, 2, 1).reshape(3 * hidden, hidden)   # [3H, H]
    brz_c = (params["bih"][0:2] + params["bhh"][0:2]).reshape(2 * hidden, 1)
    bin_c = params["bih"][2].reshape(hidden, 1)
    bhn_c = params["bhh"][2].reshape(hidden, 1)
    wpool_t = jnp.concatenate([params["wgate"].T, params["watt"].T], axis=0)  # [3, H]
    bpool_c = jnp.concatenate([params["bgate"].reshape(1, 1),
                               params["batt"].reshape(2, 1)], axis=0)         # [3, 1]

    inputs = (x_t, wred_t, bred_c, adj_t, wggc_t, wih_f, whh_f,
              brz_c, bin_c, bhn_c, wpool_t, bpool_c, seg)

    # Explicit scoped-VMEM budget: whole-resident design, clamped safely below
    # the smallest physical VMEM across generations (v7x = 64 MiB).
    arg_bytes = sum(int(a.size) * a.dtype.itemsize for a in inputs)
    vmem_limit = int(min(max(4 * arg_bytes + (2 << 20), 16 << 20), 48 << 20))

    vmem = pl.BlockSpec(memory_space=pltpu.MemorySpace.VMEM)
    return pl.pallas_call(
        functools.partial(net_kernel, n_steps=n_steps),
        out_shape=jax.ShapeDtypeStruct((num_graphs, 2), jnp.float32),
        in_specs=[vmem] * len(inputs),
        out_specs=vmem,
        compiler_params=pltpu.CompilerParams(vmem_limit_bytes=vmem_limit),
    )(*inputs)


def net_reference(x, edge_index, batch, params, *, n_steps, num_graphs):
    """Pure-JAX f32 reference mirroring torch_geometric semantics."""
    h = x @ params["wred"] + params["bred"]
    src, dst = edge_index[0], edge_index[1]
    for t in range(n_steps):
        m = h @ params["wggc"][t]
        m = jnp.zeros_like(h).at[dst].add(m[src])
        gi = [m @ params["wih"][k] + params["bih"][k] for k in range(3)]
        gh = [h @ params["whh"][k] + params["bhh"][k] for k in range(3)]
        r = jax.nn.sigmoid(gi[0] + gh[0])
        z = jax.nn.sigmoid(gi[1] + gh[1])
        n = jnp.tanh(gi[2] + r * gh[2])
        h = (1.0 - z) * n + z * h
    gate = (h @ params["wgate"] + params["bgate"])[:, 0]
    feat = h @ params["watt"] + params["batt"]
    gmax = jax.ops.segment_max(gate, batch, num_segments=num_graphs)
    e = jnp.exp(gate - gmax[batch])
    gsum = jax.ops.segment_sum(e, batch, num_segments=num_graphs)
    alpha = e / gsum[batch]
    pooled = jax.ops.segment_sum(alpha[:, None] * feat, batch, num_segments=num_graphs)
    return jax.nn.log_softmax(pooled, axis=1)


def init_params(key, annotation_size, hidden, n_steps):
    ks = jax.random.split(key, 11)
    s = 0.1
    return {
        "wred": s * jax.random.normal(ks[0], (annotation_size, hidden), jnp.float32),
        "bred": s * jax.random.normal(ks[1], (1, hidden), jnp.float32),
        "wggc": s * jax.random.normal(ks[2], (n_steps, hidden, hidden), jnp.float32),
        "wih": s * jax.random.normal(ks[3], (3, hidden, hidden), jnp.float32),
        "whh": s * jax.random.normal(ks[4], (3, hidden, hidden), jnp.float32),
        "bih": s * jax.random.normal(ks[5], (3, hidden), jnp.float32),
        "bhh": s * jax.random.normal(ks[6], (3, hidden), jnp.float32),
        "wgate": s * jax.random.normal(ks[7], (hidden, 1), jnp.float32),
        "bgate": s * jax.random.normal(ks[8], (1, 1), jnp.float32),
        "watt": s * jax.random.normal(ks[9], (hidden, 2), jnp.float32),
        "batt": s * jax.random.normal(ks[10], (1, 2), jnp.float32),
    }


if __name__ == "__main__":
    key = jax.random.PRNGKey(0)
    ANNOT, HIDDEN, N_STEPS = 24, 32, 3
    N_NODES, N_EDGES, N_GRAPHS = 16, 40, 2

    kx, ke, kp = jax.random.split(key, 3)
    x = jax.random.normal(kx, (N_NODES, ANNOT), jnp.float32)
    edge_index = jax.random.randint(ke, (2, N_EDGES), 0, N_NODES, jnp.int32)
    batch = jnp.concatenate([jnp.zeros(N_NODES // 2, jnp.int32),
                             jnp.ones(N_NODES - N_NODES // 2, jnp.int32)])
    params = init_params(kp, ANNOT, HIDDEN, N_STEPS)

    out = net_forward(x, edge_index, batch, params,
                      n_steps=N_STEPS, num_graphs=N_GRAPHS)
    out = jax.block_until_ready(out)

    ref = net_reference(x, edge_index, batch, params,
                        n_steps=N_STEPS, num_graphs=N_GRAPHS)
    # Tolerance is loosened vs a pure-f32 kernel because the edge aggregation
    # runs bf16 x bf16 -> f32 on the MXU and the softmax uses the EUP
    # approximate reciprocal.
    np.testing.assert_allclose(np.asarray(out), np.asarray(ref),
                               rtol=2e-2, atol=2e-2)

    print("KERNEL_OK")
</pallas_src>

<mosaic_0001>
module attributes {stable_mosaic.version = 11 : i64} {
  func.func @net_kernel(%arg0: memref<24x16xf32, #tpu.memory_space<vmem>>, %arg1: memref<32x24xf32, #tpu.memory_space<vmem>>, %arg2: memref<32x1xf32, #tpu.memory_space<vmem>>, %arg3: memref<16x16xbf16, #tpu.memory_space<vmem>>, %arg4: memref<3x32x32xf32, #tpu.memory_space<vmem>>, %arg5: memref<96x32xf32, #tpu.memory_space<vmem>>, %arg6: memref<96x32xf32, #tpu.memory_space<vmem>>, %arg7: memref<64x1xf32, #tpu.memory_space<vmem>>, %arg8: memref<32x1xf32, #tpu.memory_space<vmem>>, %arg9: memref<32x1xf32, #tpu.memory_space<vmem>>, %arg10: memref<3x32xf32, #tpu.memory_space<vmem>>, %arg11: memref<3x1xf32, #tpu.memory_space<vmem>>, %arg12: memref<2x16xf32, #tpu.memory_space<vmem>>, %arg13: memref<2x2xf32, #tpu.memory_space<vmem>>) attributes {dimension_semantics = [], scalar_prefetch = 0 : i64, scratch_operands = 0 : i64, tpu.core_type = #tpu.core_type<tc>} {
    %c0 = arith.constant 0 : index
    %c0_0 = arith.constant 0 : index
    %0 = vector.load %arg1[%c0, %c0_0] : memref<32x24xf32, #tpu.memory_space<vmem>>, vector<32x24xf32>
    %c0_1 = arith.constant 0 : index
    %c0_2 = arith.constant 0 : index
    %1 = vector.load %arg0[%c0_1, %c0_2] : memref<24x16xf32, #tpu.memory_space<vmem>>, vector<24x16xf32>
    %cst = arith.constant dense<0.000000e+00> : vector<32x16xf32>
    %2 = tpu.matmul %0, %1, %cst {dimension_numbers = #tpu.dot_dimension_numbers<[1], [0], [0], [1], [0, 0, 1, 1], [], []>} : vector<32x24xf32>, vector<24x16xf32>, vector<32x16xf32> -> vector<32x16xf32>
    %c0_3 = arith.constant 0 : index
    %c0_4 = arith.constant 0 : index
    %3 = vector.load %arg2[%c0_3, %c0_4] : memref<32x1xf32, #tpu.memory_space<vmem>>, vector<32x1xf32>
    %4 = vector.broadcast %3 : vector<32x1xf32> to vector<32x16xf32>
    %5 = arith.addf %2, %4 : vector<32x16xf32>
    %c0_5 = arith.constant 0 : index
    %c0_6 = arith.constant 0 : index
    %6 = vector.load %arg3[%c0_5, %c0_6] : memref<16x16xbf16, #tpu.memory_space<vmem>>, vector<16x16xbf16>
    %c0_7 = arith.constant 0 : index
    %c0_8 = arith.constant 0 : index
    %7 = vector.load %arg5[%c0_7, %c0_8] : memref<96x32xf32, #tpu.memory_space<vmem>>, vector<96x32xf32>
    %c0_9 = arith.constant 0 : index
    %c0_10 = arith.constant 0 : index
    %8 = vector.load %arg6[%c0_9, %c0_10] : memref<96x32xf32, #tpu.memory_space<vmem>>, vector<96x32xf32>
    %c0_11 = arith.constant 0 : index
    %c0_12 = arith.constant 0 : index
    %9 = vector.load %arg7[%c0_11, %c0_12] : memref<64x1xf32, #tpu.memory_space<vmem>>, vector<64x1xf32>
    %10 = vector.shape_cast %9 : vector<64x1xf32> to vector<64x1xf32>
    %11 = vector.broadcast %10 : vector<64x1xf32> to vector<64x16xf32>
    %c0_13 = arith.constant 0 : index
    %c0_14 = arith.constant 0 : index
    %12 = vector.load %arg8[%c0_13, %c0_14] : memref<32x1xf32, #tpu.memory_space<vmem>>, vector<32x1xf32>
    %13 = vector.shape_cast %12 : vector<32x1xf32> to vector<32x1xf32>
    %14 = vector.broadcast %13 : vector<32x1xf32> to vector<32x16xf32>
    %c0_15 = arith.constant 0 : index
    %c0_16 = arith.constant 0 : index
    %15 = vector.load %arg9[%c0_15, %c0_16] : memref<32x1xf32, #tpu.memory_space<vmem>>, vector<32x1xf32>
    %16 = vector.shape_cast %15 : vector<32x1xf32> to vector<32x1xf32>
    %17 = vector.broadcast %16 : vector<32x1xf32> to vector<32x16xf32>
    %c0_17 = arith.constant 0 : index
    %c0_18 = arith.constant 0 : index
    %c0_19 = arith.constant 0 : index
    %18 = vector.load %arg4[%c0_17, %c0_18, %c0_19] : memref<3x32x32xf32, #tpu.memory_space<vmem>>, vector<1x32x32xf32>
    %19 = vector.shape_cast %18 : vector<1x32x32xf32> to vector<32x32xf32>
    %cst_20 = arith.constant dense<0.000000e+00> : vector<32x16xf32>
    %20 = tpu.matmul %19, %5, %cst_20 {dimension_numbers = #tpu.dot_dimension_numbers<[1], [0], [0], [1], [0, 0, 1, 1], [], []>} : vector<32x32xf32>, vector<32x16xf32>, vector<32x16xf32> -> vector<32x16xf32>
    %21 = arith.truncf %20 : vector<32x16xf32> to vector<32x16xbf16>
    %cst_21 = arith.constant dense<0.000000e+00> : vector<32x16xf32>
    %22 = tpu.matmul %21, %6, %cst_21 {dimension_numbers = #tpu.dot_dimension_numbers<[1], [0], [0], [1], [0, 0, 1, 1], [], []>} : vector<32x16xbf16>, vector<16x16xbf16>, vector<32x16xf32> -> vector<32x16xf32>
    %cst_22 = arith.constant dense<0.000000e+00> : vector<96x16xf32>
    %23 = tpu.matmul %7, %22, %cst_22 {dimension_numbers = #tpu.dot_dimension_numbers<[1], [0], [0], [1], [0, 0, 1, 1], [], []>} : vector<96x32xf32>, vector<32x16xf32>, vector<96x16xf32> -> vector<96x16xf32>
    %cst_23 = arith.constant dense<0.000000e+00> : vector<96x16xf32>
    %24 = tpu.matmul %8, %5, %cst_23 {dimension_numbers = #tpu.dot_dimension_numbers<[1], [0], [0], [1], [0, 0, 1, 1], [], []>} : vector<96x32xf32>, vector<32x16xf32>, vector<96x16xf32> -> vector<96x16xf32>
    %25 = vector.extract_strided_slice %23 {offsets = [0, 0], sizes = [64, 16], strides = [1, 1]} : vector<96x16xf32> to vector<64x16xf32>
    %26 = vector.extract_strided_slice %24 {offsets = [0, 0], sizes = [64, 16], strides = [1, 1]} : vector<96x16xf32> to vector<64x16xf32>
    %27 = arith.addf %25, %26 : vector<64x16xf32>
    %28 = arith.addf %27, %11 : vector<64x16xf32>
    %29 = arith.negf %28 : vector<64x16xf32>
    %30 = math.exp %29 : vector<64x16xf32>
    %cst_24 = arith.constant 1.000000e+00 : f32
    %31 = vector.broadcast %cst_24 : f32 to vector<64x16xf32>
    %32 = arith.addf %31, %30 : vector<64x16xf32>
    %33 = arith.divf %31, %32 : vector<64x16xf32>
    %34 = vector.extract_strided_slice %33 {offsets = [0, 0], sizes = [32, 16], strides = [1, 1]} : vector<64x16xf32> to vector<32x16xf32>
    %35 = vector.extract_strided_slice %33 {offsets = [32, 0], sizes = [32, 16], strides = [1, 1]} : vector<64x16xf32> to vector<32x16xf32>
    %36 = vector.extract_strided_slice %23 {offsets = [64, 0], sizes = [32, 16], strides = [1, 1]} : vector<96x16xf32> to vector<32x16xf32>
    %37 = arith.addf %36, %14 : vector<32x16xf32>
    %38 = vector.extract_strided_slice %24 {offsets = [64, 0], sizes = [32, 16], strides = [1, 1]} : vector<96x16xf32> to vector<32x16xf32>
    %39 = arith.addf %38, %17 : vector<32x16xf32>
    %40 = arith.mulf %34, %39 : vector<32x16xf32>
    %41 = arith.addf %37, %40 : vector<32x16xf32>
    %42 = math.tanh %41 : vector<32x16xf32>
    %cst_25 = arith.constant 1.000000e+00 : f32
    %43 = vector.broadcast %cst_25 : f32 to vector<32x16xf32>
    %44 = arith.subf %43, %35 : vector<32x16xf32>
    %45 = arith.mulf %44, %42 : vector<32x16xf32>
    %46 = arith.mulf %35, %5 : vector<32x16xf32>
    %47 = arith.addf %45, %46 : vector<32x16xf32>
    %c1 = arith.constant 1 : index
    %c0_26 = arith.constant 0 : index
    %c0_27 = arith.constant 0 : index
    %48 = vector.load %arg4[%c1, %c0_26, %c0_27] : memref<3x32x32xf32, #tpu.memory_space<vmem>>, vector<1x32x32xf32>
    %49 = vector.shape_cast %48 : vector<1x32x32xf32> to vector<32x32xf32>
    %cst_28 = arith.constant dense<0.000000e+00> : vector<32x16xf32>
    %50 = tpu.matmul %49, %47, %cst_28 {dimension_numbers = #tpu.dot_dimension_numbers<[1], [0], [0], [1], [0, 0, 1, 1], [], []>} : vector<32x32xf32>, vector<32x16xf32>, vector<32x16xf32> -> vector<32x16xf32>
    %51 = arith.truncf %50 : vector<32x16xf32> to vector<32x16xbf16>
    %cst_29 = arith.constant dense<0.000000e+00> : vector<32x16xf32>
    %52 = tpu.matmul %51, %6, %cst_29 {dimension_numbers = #tpu.dot_dimension_numbers<[1], [0], [0], [1], [0, 0, 1, 1], [], []>} : vector<32x16xbf16>, vector<16x16xbf16>, vector<32x16xf32> -> vector<32x16xf32>
    %cst_30 = arith.constant dense<0.000000e+00> : vector<96x16xf32>
    %53 = tpu.matmul %7, %52, %cst_30 {dimension_numbers = #tpu.dot_dimension_numbers<[1], [0], [0], [1], [0, 0, 1, 1], [], []>} : vector<96x32xf32>, vector<32x16xf32>, vector<96x16xf32> -> vector<96x16xf32>
    %cst_31 = arith.constant dense<0.000000e+00> : vector<96x16xf32>
    %54 = tpu.matmul %8, %47, %cst_31 {dimension_numbers = #tpu.dot_dimension_numbers<[1], [0], [0], [1], [0, 0, 1, 1], [], []>} : vector<96x32xf32>, vector<32x16xf32>, vector<96x16xf32> -> vector<96x16xf32>
    %55 = vector.extract_strided_slice %53 {offsets = [0, 0], sizes = [64, 16], strides = [1, 1]} : vector<96x16xf32> to vector<64x16xf32>
    %56 = vector.extract_strided_slice %54 {offsets = [0, 0], sizes = [64, 16], strides = [1, 1]} : vector<96x16xf32> to vector<64x16xf32>
    %57 = arith.addf %55, %56 : vector<64x16xf32>
    %58 = arith.addf %57, %11 : vector<64x16xf32>
    %59 = arith.negf %58 : vector<64x16xf32>
    %60 = math.exp %59 : vector<64x16xf32>
    %cst_32 = arith.constant 1.000000e+00 : f32
    %61 = vector.broadcast %cst_32 : f32 to vector<64x16xf32>
    %62 = arith.addf %61, %60 : vector<64x16xf32>
    %63 = arith.divf %61, %62 : vector<64x16xf32>
    %64 = vector.extract_strided_slice %63 {offsets = [0, 0], sizes = [32, 16], strides = [1, 1]} : vector<64x16xf32> to vector<32x16xf32>
    %65 = vector.extract_strided_slice %63 {offsets = [32, 0], sizes = [32, 16], strides = [1, 1]} : vector<64x16xf32> to vector<32x16xf32>
    %66 = vector.extract_strided_slice %53 {offsets = [64, 0], sizes = [32, 16], strides = [1, 1]} : vector<96x16xf32> to vector<32x16xf32>
    %67 = arith.addf %66, %14 : vector<32x16xf32>
    %68 = vector.extract_strided_slice %54 {offsets = [64, 0], sizes = [32, 16], strides = [1, 1]} : vector<96x16xf32> to vector<32x16xf32>
    %69 = arith.addf %68, %17 : vector<32x16xf32>
    %70 = arith.mulf %64, %69 : vector<32x16xf32>
    %71 = arith.addf %67, %70 : vector<32x16xf32>
    %72 = math.tanh %71 : vector<32x16xf32>
    %cst_33 = arith.constant 1.000000e+00 : f32
    %73 = vector.broadcast %cst_33 : f32 to vector<32x16xf32>
    %74 = arith.subf %73, %65 : vector<32x16xf32>
    %75 = arith.mulf %74, %72 : vector<32x16xf32>
    %76 = arith.mulf %65, %47 : vector<32x16xf32>
    %77 = arith.addf %75, %76 : vector<32x16xf32>
    %c2 = arith.constant 2 : index
    %c0_34 = arith.constant 0 : index
    %c0_35 = arith.constant 0 : index
    %78 = vector.load %arg4[%c2, %c0_34, %c0_35] : memref<3x32x32xf32, #tpu.memory_space<vmem>>, vector<1x32x32xf32>
    %79 = vector.shape_cast %78 : vector<1x32x32xf32> to vector<32x32xf32>
    %cst_36 = arith.constant dense<0.000000e+00> : vector<32x16xf32>
    %80 = tpu.matmul %79, %77, %cst_36 {dimension_numbers = #tpu.dot_dimension_numbers<[1], [0], [0], [1], [0, 0, 1, 1], [], []>} : vector<32x32xf32>, vector<32x16xf32>, vector<32x16xf32> -> vector<32x16xf32>
    %81 = arith.truncf %80 : vector<32x16xf32> to vector<32x16xbf16>
    %cst_37 = arith.constant dense<0.000000e+00> : vector<32x16xf32>
    %82 = tpu.matmul %81, %6, %cst_37 {dimension_numbers = #tpu.dot_dimension_numbers<[1], [0], [0], [1], [0, 0, 1, 1], [], []>} : vector<32x16xbf16>, vector<16x16xbf16>, vector<32x16xf32> -> vector<32x16xf32>
    %cst_38 = arith.constant dense<0.000000e+00> : vector<96x16xf32>
    %83 = tpu.matmul %7, %82, %cst_38 {dimension_numbers = #tpu.dot_dimension_numbers<[1], [0], [0], [1], [0, 0, 1, 1], [], []>} : vector<96x32xf32>, vector<32x16xf32>, vector<96x16xf32> -> vector<96x16xf32>
    %cst_39 = arith.constant dense<0.000000e+00> : vector<96x16xf32>
    %84 = tpu.matmul %8, %77, %cst_39 {dimension_numbers = #tpu.dot_dimension_numbers<[1], [0], [0], [1], [0, 0, 1, 1], [], []>} : vector<96x32xf32>, vector<32x16xf32>, vector<96x16xf32> -> vector<96x16xf32>
    %85 = vector.extract_strided_slice %83 {offsets = [0, 0], sizes = [64, 16], strides = [1, 1]} : vector<96x16xf32> to vector<64x16xf32>
    %86 = vector.extract_strided_slice %84 {offsets = [0, 0], sizes = [64, 16], strides = [1, 1]} : vector<96x16xf32> to vector<64x16xf32>
    %87 = arith.addf %85, %86 : vector<64x16xf32>
    %88 = arith.addf %87, %11 : vector<64x16xf32>
    %89 = arith.negf %88 : vector<64x16xf32>
    %90 = math.exp %89 : vector<64x16xf32>
    %cst_40 = arith.constant 1.000000e+00 : f32
    %91 = vector.broadcast %cst_40 : f32 to vector<64x16xf32>
    %92 = arith.addf %91, %90 : vector<64x16xf32>
    %93 = arith.divf %91, %92 : vector<64x16xf32>
    %94 = vector.extract_strided_slice %93 {offsets = [0, 0], sizes = [32, 16], strides = [1, 1]} : vector<64x16xf32> to vector<32x16xf32>
    %95 = vector.extract_strided_slice %93 {offsets = [32, 0], sizes = [32, 16], strides = [1, 1]} : vector<64x16xf32> to vector<32x16xf32>
    %96 = vector.extract_strided_slice %83 {offsets = [64, 0], sizes = [32, 16], strides = [1, 1]} : vector<96x16xf32> to vector<32x16xf32>
    %97 = arith.addf %96, %14 : vector<32x16xf32>
    %98 = vector.extract_strided_slice %84 {offsets = [64, 0], sizes = [32, 16], strides = [1, 1]} : vector<96x16xf32> to vector<32x16xf32>
    %99 = arith.addf %98, %17 : vector<32x16xf32>
    %100 = arith.mulf %94, %99 : vector<32x16xf32>
    %101 = arith.addf %97, %100 : vector<32x16xf32>
    %102 = math.tanh %101 : vector<32x16xf32>
    %cst_41 = arith.constant 1.000000e+00 : f32
    %103 = vector.broadcast %cst_41 : f32 to vector<32x16xf32>
    %104 = arith.subf %103, %95 : vector<32x16xf32>
    %105 = arith.mulf %104, %102 : vector<32x16xf32>
    %106 = arith.mulf %95, %77 : vector<32x16xf32>
    %107 = arith.addf %105, %106 : vector<32x16xf32>
    %c0_42 = arith.constant 0 : index
    %c0_43 = arith.constant 0 : index
    %108 = vector.load %arg12[%c0_42, %c0_43] : memref<2x16xf32, #tpu.memory_space<vmem>>, vector<2x16xf32>
    %c0_44 = arith.constant 0 : index
    %c0_45 = arith.constant 0 : index
    %109 = vector.load %arg10[%c0_44, %c0_45] : memref<3x32xf32, #tpu.memory_space<vmem>>, vector<3x32xf32>
    %cst_46 = arith.constant dense<0.000000e+00> : vector<3x16xf32>
    %110 = tpu.matmul %109, %107, %cst_46 {dimension_numbers = #tpu.dot_dimension_numbers<[1], [0], [0], [1], [0, 0, 1, 1], [], []>} : vector<3x32xf32>, vector<32x16xf32>, vector<3x16xf32> -> vector<3x16xf32>
    %c0_47 = arith.constant 0 : index
    %c0_48 = arith.constant 0 : index
    %111 = vector.load %arg11[%c0_47, %c0_48] : memref<3x1xf32, #tpu.memory_space<vmem>>, vector<3x1xf32>
    %112 = vector.broadcast %111 : vector<3x1xf32> to vector<3x16xf32>
    %113 = arith.addf %110, %112 : vector<3x16xf32>
    %114 = vector.extract_strided_slice %113 {offsets = [0, 0], sizes = [1, 16], strides = [1, 1]} : vector<3x16xf32> to vector<1x16xf32>
    %115 = vector.extract_strided_slice %113 {offsets = [1, 0], sizes = [2, 16], strides = [1, 1]} : vector<3x16xf32> to vector<2x16xf32>
    %cst_49 = arith.constant 0.000000e+00 : f32
    %116 = vector.broadcast %cst_49 : f32 to vector<2x16xf32>
    %117 = arith.cmpf ogt, %108, %116 : vector<2x16xf32>
    %cst_50 = arith.constant -1.000000e+30 : f32
    %118 = vector.shape_cast %114 : vector<1x16xf32> to vector<1x16xf32>
    %119 = vector.broadcast %118 : vector<1x16xf32> to vector<2x16xf32>
    %120 = vector.broadcast %cst_50 : f32 to vector<2x16xf32>
    %121 = arith.select %117, %119, %120 : vector<2x16xi1>, vector<2x16xf32>
    %cst_51 = arith.constant dense<0xFF800000> : vector<2xf32>
    %122 = vector.multi_reduction <maximumf>, %121, %cst_51 [1] : vector<2x16xf32> to vector<2xf32>
    %123 = vector.shape_cast %122 : vector<2xf32> to vector<2x1xf32>
    %124 = vector.broadcast %123 : vector<2x1xf32> to vector<2x16xf32>
    %125 = arith.mulf %108, %124 : vector<2x16xf32>
    %cst_52 = arith.constant dense<0.000000e+00> : vector<16xf32>
    %126 = vector.multi_reduction <add>, %125, %cst_52 [0] : vector<2x16xf32> to vector<16xf32>
    %127 = vector.shape_cast %126 : vector<16xf32> to vector<1x16xf32>
    %128 = arith.subf %114, %127 : vector<1x16xf32>
    %129 = math.exp %128 : vector<1x16xf32>
    %130 = vector.broadcast %129 : vector<1x16xf32> to vector<2x16xf32>
    %131 = arith.mulf %108, %130 : vector<2x16xf32>
    %cst_53 = arith.constant dense<0.000000e+00> : vector<2xf32>
    %132 = vector.multi_reduction <add>, %131, %cst_53 [1] : vector<2x16xf32> to vector<2xf32>
    %133 = vector.shape_cast %132 : vector<2xf32> to vector<2x1xf32>
    %134 = vector.broadcast %133 : vector<2x1xf32> to vector<2x16xf32>
    %135 = arith.mulf %108, %134 : vector<2x16xf32>
    %cst_54 = arith.constant dense<0.000000e+00> : vector<16xf32>
    %136 = vector.multi_reduction <add>, %135, %cst_54 [0] : vector<2x16xf32> to vector<16xf32>
    %137 = vector.shape_cast %136 : vector<16xf32> to vector<1x16xf32>
    %138 = tpu.reciprocal %137 {approx = true} : vector<1x16xf32> -> vector<1x16xf32>
    %139 = arith.mulf %129, %138 : vector<1x16xf32>
    %140 = vector.broadcast %139 : vector<1x16xf32> to vector<2x16xf32>
    %141 = arith.mulf %140, %115 : vector<2x16xf32>
    %cst_55 = arith.constant dense<0.000000e+00> : vector<2x2xf32>
    %142 = tpu.matmul %108, %141, %cst_55 {dimension_numbers = #tpu.dot_dimension_numbers<[1], [1], [0], [0], [0, 0, 1, 0], [], []>} : vector<2x16xf32>, vector<2x16xf32>, vector<2x2xf32> -> vector<2x2xf32>
    %cst_56 = arith.constant dense<0xFF800000> : vector<2xf32>
    %143 = vector.multi_reduction <maximumf>, %142, %cst_56 [1] : vector<2x2xf32> to vector<2xf32>
    %144 = vector.shape_cast %143 : vector<2xf32> to vector<2x1xf32>
    %145 = vector.broadcast %144 : vector<2x1xf32> to vector<2x2xf32>
    %146 = arith.subf %142, %145 : vector<2x2xf32>
    %147 = math.exp %146 : vector<2x2xf32>
    %cst_57 = arith.constant dense<0.000000e+00> : vector<2xf32>
    %148 = vector.multi_reduction <add>, %147, %cst_57 [1] : vector<2x2xf32> to vector<2xf32>
    %149 = vector.shape_cast %148 : vector<2xf32> to vector<2x1xf32>
    %150 = math.log %149 : vector<2x1xf32>
    %151 = vector.broadcast %150 : vector<2x1xf32> to vector<2x2xf32>
    %152 = arith.subf %146, %151 : vector<2x2xf32>
    %c0_58 = arith.constant 0 : index
    %c0_59 = arith.constant 0 : index
    %153 = vector.load %arg13[%c0_58, %c0_59] : memref<2x2xf32, #tpu.memory_space<vmem>>, vector<2x2xf32>
    tpu.vector_store %arg13[%c0_58, %c0_59], %152 {strides = array<i32>} : memref<2x2xf32, #tpu.memory_space<vmem>>, vector<2x2xf32>,
    return
  }
}

</mosaic_0001>

<bundles_post_ra>
// kernel: tpu_custom_call.1
= control target key start
LH: loop header
LB: loop body
LE: loop exit
PB: predicated region body
PF: predicated region fallthrough
CT: control target
= control target key end

     0   :  { %vm77_vm0 = vcmask 195584   ;;  %v2920_v4 = vmov 0   ;;  %s3605_s0 = inlined_call_operand.vmem [shape: f32[24,16], index: 0, kind: input, shape index: {}]   ;;  %s3606_s1 = inlined_call_operand.vmem [shape: f32[32,24], index: 1, kind: input, shape index: {}]   ;;  %s3607_s2 = inlined_call_operand.vmem [shape: f32[32,1], index: 2, kind: input, shape index: {}]   ;;  %s3608_s3 = inlined_call_operand.vmem [shape: bf16[16,16], index: 3, kind: input, shape index: {}]   ;;  %s3609_s4 = inlined_call_operand.vmem [shape: f32[3,32,32], index: 4, kind: input, shape index: {}]   ;;  %s3610_s5 = inlined_call_operand.vmem [shape: f32[96,32], index: 5, kind: input, shape index: {}]   ;;  %s3611_s6 = inlined_call_operand.vmem [shape: f32[96,32], index: 6, kind: input, shape index: {}]   ;;  %s3612_s7 = inlined_call_operand.vmem [shape: f32[64,1], index: 7, kind: input, shape index: {}]   ;;  %s3613_s8 = inlined_call_operand.vmem [shape: f32[32,1], index: 8, kind: input, shape index: {}]   ;;  %s3614_s9 = inlined_call_operand.vmem [shape: f32[32,1], index: 9, kind: input, shape index: {}]   ;;  %s3615_s10 = inlined_call_operand.vmem [shape: f32[3,32], index: 10, kind: input, shape index: {}]   ;;  %s3616_s11 = inlined_call_operand.vmem [shape: f32[3,1], index: 11, kind: input, shape index: {}]   ;;  %s3617_s12 = inlined_call_operand.vmem [shape: f32[2,16], index: 12, kind: input, shape index: {}]   ;;  %s3618_s13 = inlined_call_operand.hbm [shape: f32[2,2], index: 13, kind: output, shape index: {}]  }
   0x1   :  { %v50_v0 = vld [vmem:[%s3605_s0] sm:$0xff]  ;;  %v51_v1 = vld [vmem:[%s3605_s0 + $0x8] sm:$0xff]  ;;  %2765 = vset.pattern.permute.xlu0 %v2920_v4  ;;  %2766 = vset.pattern.permute.xlu1 %v2920_v4  ;;  %v52_v5 = vld [vmem:[%s3605_s0 + $0x10] sm:$0xff] }
   0x2   :  { %v2650_v2 = vpack.c.bf16 %v51_v1, %v50_v0  ;;  %v46_v3 = vld [vmem:[%s3606_s1] sm:$0xff]  ;;  %v55_v7 = vld [vmem:[%s3607_s2 + $0x10] sm:$0xff]  ;;  %v54_v8 = vld [vmem:[%s3607_s2 + $0x8] sm:$0xff] }
   0x3   :  { %2412 = vmatprep.mubr.msk.f32.mxu0 %vm77_vm0, %v46_v3  ;;  %v53_v6 = vld [vmem:[%s3607_s2] sm:$0xff]  ;;  %69 = vperm.xlu1 %2766, %v55_v7   ;;  %v56_v9 = vld [vmem:[%s3607_s2 + $0x18] sm:$0xff]  ;;  %v47_v10 = vld [vmem:[%s3606_s1 + $0x8] sm:$0xff] }
   0x4   :  { %2651 = vmatprep.subr.bf16.mxu0 %v2650_v2  ;;  %59 = vperm.xlu0 %2765, %v53_v6   ;;  %v48_v11 = vld [vmem:[%s3606_s1 + $0x10] sm:$0xff]  ;;  %v201_v12 = vld [vmem:[%s3612_s7] sm:$0xff]  ;;  %v202_v13 = vld [vmem:[%s3612_s7 + $0x8] sm:$0xff] }
   0x5   :  { %2653 = vmatpush3.bf16.msra.mxu0 %v2650_v2  ;;  %v49_v14 = vld [vmem:[%s3606_s1 + $0x18] sm:$0xff] }
   0x6   :  { %2410 = vmatprep.subr.mxu0 %v52_v5 }
   0x7   :  { %74 = vperm.xlu1 %2766, %v56_v9  }
   0x8   :  { %64 = vperm.xlu0 %2765, %v54_v8  }
   0x9   :  { %2411 = vmatpush3.msra.mxu0 %v52_v5 }
   0xa   :  { %2413 = vmatmul.mubr.msk.f32.vlgmr.msra.gmra.mrb[0].mxu0 %vm77_vm0, %v47_v10 }
   0xb   :  { %2415 = vmatprep.mubr.msk.f32.mxu0 %vm77_vm0, %v48_v11 }
   0xc   :  { %18 = vsyncpa [#allocation3], 0  ;;  %211 = vperm.xlu0 %2765, %v201_v12   ;;  %v203_v15 = vld [vmem:[%s3612_s7 + $0x10] sm:$0xff]  ;;  %216 = vperm.xlu1 %2766, %v202_v13   ;;  %v204_v16 = vld [vmem:[%s3612_s7 + $0x18] sm:$0xff]  ;;  %vm301_vm1 = vcmask 261120   ;;  %vm407_vm2 = vcmask 130048  }
   0xd   :  { %v205_v17 = vld [vmem:[%s3612_s7 + $0x20] sm:$0xff]  ;;  %v206_v18 = vld [vmem:[%s3612_s7 + $0x28] sm:$0xff]  ;;  %v207_v19 = vld [vmem:[%s3612_s7 + $0x30] sm:$0xff]  ;;  %vm2922_vm3 = vmmov 0   ;;  %vm1990_vm5 = vcmask 123904   ;;  %vm2105_vm6 = vcmask 9216  }
   0xe   :  { %2416 = vmatmul.mubr.msk.f32.gmra.mrb[2].mxu0 %vm77_vm0, %v49_v14  ;;  %v208_v20 = vld [vmem:[%s3612_s7 + $0x38] sm:$0xff]  ;;  %v273_v21 = vld [vmem:[%s3614_s9] sm:$0xff]  ;;  %v274_v22 = vld [vmem:[%s3614_s9 + $0x8] sm:$0xff] }
   0xf   :  { %v249_v23 = vld [vmem:[%s3613_s8] sm:$0xff]  ;;  %v250_v24 = vld [vmem:[%s3613_s8 + $0x8] sm:$0xff]  ;;  %v275_v25 = vld [vmem:[%s3614_s9 + $0x10] sm:$0xff] }
  0x10   :  { %221 = vperm.xlu0 %2765, %v203_v15   ;;  %226 = vperm.xlu1 %2766, %v204_v16   ;;  %v276_v26 = vld [vmem:[%s3614_s9 + $0x18] sm:$0xff]  ;;  %v251_v27 = vld [vmem:[%s3613_s8 + $0x10] sm:$0xff]  ;;  %v1905_v29 = vld [vmem:[%s3616_s11] sm:$0x7] }
  0x11   :  { %v252_v28 = vld [vmem:[%s3613_s8 + $0x18] sm:$0xff]  ;;  %v297_v30 = vld [vmem:[%s3609_s4] sm:$0xff]  ;;  %v298_v45 = vld [vmem:[%s3609_s4 + $0x8] sm:$0xff] }
  0x12   :  { %2426 = vmatprep.mubr.msk.f32.mxu1 %vm301_vm1, %v297_v30  ;;  %v299_v46 = vld [vmem:[%s3609_s4 + $0x10] sm:$0xff]  ;;  %v300_v47 = vld [vmem:[%s3609_s4 + $0x18] sm:$0xff]  ;;  %v3114_v48 = vld [vmem:[%s3608_s3] sm:$0xff]  }
  0x13   :  { %2432 = vmatprep.subr.bf16.mxu0 %v3114_v48  ;;  %v3123_v55 = vld [vmem:[%s3610_s5 + $0x40] sm:$0xff]  ;;  %v3137_v63 = vld [vmem:[%s3610_s5 + $0x48] sm:$0xff]  ;;  %v3147_v1 = vld [vmem:[%s3610_s5 + $0x50] sm:$0xff] }
  0x14   :  { %231 = vperm.xlu0 %2765, %v205_v17   ;;  %236 = vperm.xlu1 %2766, %v206_v18   ;;  %v3130_v56 = vld [vmem:[%s3610_s5] sm:$0xff]  ;;  %v3142_v0 = vld [vmem:[%s3610_s5 + $0x8] sm:$0xff]  ;;  %v3152_v2 = vld [vmem:[%s3610_s5 + $0x10] sm:$0xff] }
  0x15   :  { %2433 = vmatpush3.bf16.msra.mxu0 %v3114_v48  ;;  %v3163_v3 = vld [vmem:[%s3610_s5 + $0x58] sm:$0xff]  ;;  %v3173_v5 = vld [vmem:[%s3611_s6] sm:$0xff]  ;;  %v3191_v7 = vld [vmem:[%s3611_s6 + $0x8] sm:$0xff] }
  0x16   :  { %v3168_v4 = vld [vmem:[%s3610_s5 + $0x18] sm:$0xff]  ;;  %v3180_v6 = vld [vmem:[%s3610_s5 + $0x20] sm:$0xff]  ;;  %v3196_v8 = vld [vmem:[%s3610_s5 + $0x28] sm:$0xff] }
  0x17   :  { %v3201_v9 = vld [vmem:[%s3611_s6 + $0x10] sm:$0xff]  ;;  %v3219_v11 = vld [vmem:[%s3611_s6 + $0x18] sm:$0xff]  ;;  %v3231_v13 = vld [vmem:[%s3611_s6 + $0x20] sm:$0xff] }
  0x18   :  { %241 = vperm.xlu0 %2765, %v207_v19   ;;  %246 = vperm.xlu1 %2766, %v208_v20   ;;  %v3208_v10 = vld [vmem:[%s3610_s5 + $0x30] sm:$0xff]  ;;  %v3226_v12 = vld [vmem:[%s3610_s5 + $0x38] sm:$0xff]  ;;  %v3242_v14 = vld [vmem:[%s3611_s6 + $0x28] sm:$0xff] }
  0x19   :  { %v3247_v15 = vld [vmem:[%s3611_s6 + $0x30] sm:$0xff]  ;;  %v3256_v16 = vld [vmem:[%s3611_s6 + $0x38] sm:$0xff]  ;;  %v3261_v17 = vld [vmem:[%s3611_s6 + $0x40] sm:$0xff] }
  0x1a   :  { %v3270_v18 = vld [vmem:[%s3611_s6 + $0x48] sm:$0xff]  ;;  %v3275_v19 = vld [vmem:[%s3611_s6 + $0x50] sm:$0xff]  ;;  %v3284_v20 = vld [vmem:[%s3611_s6 + $0x58] sm:$0xff] }
  0x1c   :  { %279 = vperm.xlu0 %2765, %v273_v21   ;;  %284 = vperm.xlu1 %2766, %v274_v22   ;;  %v2176_v21 = vld [vmem:[%s3609_s4 + $0x20] sm:$0xff] }
  0x20   :  { %255 = vperm.xlu0 %2765, %v249_v23   ;;  %260 = vperm.xlu1 %2766, %v250_v24  }
  0x24   :  { %289 = vperm.xlu0 %2765, %v275_v25   ;;  %294 = vperm.xlu1 %2766, %v276_v26  }
  0x28   :  { %265 = vperm.xlu0 %2765, %v251_v27   ;;  %270 = vperm.xlu1 %2766, %v252_v28  }
  0x2c   :  { %1908 = vperm.xlu0 %2765, %v1905_v29  }
  0x82   :  { %v70_v32 = vpop.permute.xlu1 %69 }
  0x83   :  { %v60_v31 = vpop.permute.xlu0 %59 }
  0x86   :  { %v75_v38 = vpop.permute.xlu1 %74 }
  0x87   :  { %v65_v33 = vpop.permute.xlu0 %64 }
  0x8b   :  { %v3292_v22 = vpop.permute.xlu0 %211  ;;  %v3294_v23 = vpop.permute.xlu1 %216 }
  0x8f   :  { %v3300_v28 = vpop.permute.xlu0 %221  ;;  %v3302_v29 = vpop.permute.xlu1 %226 }
  0x90   :  { %3630 = vst [vmem:[#allocation5_spill] sm:$0xff] %v3300_v28 }
  0xdd   :  { %v2414_v34 = vpop.f32.mrb[0].mxu0 }
  0xde   :  { %v3087_v35 = vadd.f32 %v2414_v34, %v65_v33  ;;  %v156_v36 = vpop.f32.mrb[1].mxu0 }
  0xdf   :  { %v3089_v37 = vadd.f32 %v156_v36, %v60_v31 }
  0xe1   :  { %v2654_v39 = vpack.c.bf16 %v3087_v35, %v3089_v37  ;;  %v2417_v40 = vpop.f32.mrb[2].mxu0 }
  0xe2   :  { %v3093_v41 = vadd.f32 %v2417_v40, %v75_v38  ;;  %v166_v42 = vpop.f32.mrb[3].mxu0 }
  0xe3   :  { %v3095_v43 = vadd.f32 %v166_v42, %v70_v32  ;;  %2655 = vmatprep.subr.bf16.mxu1 %v2654_v39 }
  0xe4   :  { %2657 = vmatpush3.bf16.msra.mxu1 %v2654_v39 }
  0xe5   :  { %v2658_v44 = vpack.c.bf16 %v3093_v41, %v3095_v43 }
  0xe7   :  { %2659 = vmatprep.subr.bf16.mxu1 %v2658_v44 }
  0xe8   :  { %2661 = vmatpush3.bf16.msra.mxu1 %v2658_v44 }
  0xeb   :  { %2427 = vmatmul.mubr.msk.f32.vlgmr.msra.gmra.mrb[0].mxu1 %vm301_vm1, %v298_v45  ;;  %v3310_v45 = vpop.permute.xlu1 %236 }
  0xec   :  { %2429 = vmatprep.mubr.msk.f32.mxu1 %vm301_vm1, %v299_v46  ;;  %3632 = vst [vmem:[#allocation7_spill] sm:$0xff] %v3310_v45 }
  0xef   :  { %2430 = vmatmul.mubr.msk.f32.gmra.mrb[2].mxu1 %vm301_vm1, %v300_v47 }
  0xf0   :  { %2458 = vmatprep.mubr.msk.f32.mxu1 %vm301_vm1, %v3123_v55 }
 0x1be   :  { %v2428_v49 = vpop.f32.mrb[0].mxu1 }
 0x1bf   :  { %v380_v50 = vpop.f32.mrb[1].mxu1 }
 0x1c0   :  { %v399_v51 = vpack.c.bf16 %v2428_v49, %v380_v50 }
 0x1c2   :  { %v2431_v52 = vpop.f32.mrb[2].mxu1  ;;  %2434 = vmatprep.mubr.msk.bf16.mxu0 %vm407_vm2, %v399_v51 }
 0x1c3   :  { %v390_v53 = vpop.f32.mrb[3].mxu1 }
 0x1c4   :  { %v400_v54 = vpack.c.bf16 %v2431_v52, %v390_v53 }
 0x1c6   :  { %2435 = vmatmul.mubr.msk.bf16.vlgmr.msra.gmra.mrb[4].mxu0 %vm407_vm2, %v400_v54 }
 0x1c7   :  { %2446 = vmatprep.mubr.msk.f32.mxu0 %vm301_vm1, %v3130_v56 }
 0x299   :  { %v2436_v57 = vpop.f32.mrb[4].mxu0 }
 0x29a   :  { %v448_v58 = vpop.f32.mrb[5].mxu0 }
 0x29b   :  { %v2437_v59 = vpop.f32.mrb[6].mxu0 }
 0x29c   :  { %v2666_v60 = vpack.c.bf16 %v2437_v59, %v2436_v57  ;;  %v451_v61 = vpop.f32.mrb[7].mxu0 }
 0x29d   :  { %v2662_v62 = vpack.c.bf16 %v451_v61, %v448_v58 }
 0x29f   :  { %2663 = vmatprep.subr.bf16.mxu0 %v2662_v62  ;;  %2732 = vmatprep.subr.bf16.mxu1 %v2662_v62 }
 0x2a0   :  { %2665 = vmatpush3.bf16.msra.mxu0 %v2662_v62  ;;  %2734 = vmatpush3.bf16.msra.mxu1 %v2662_v62 }
 0x2a1   :  { %2667 = vmatprep.subr.bf16.mxu0 %v2666_v60  ;;  %2733 = vmatprep.subr.bf16.mxu1 %v2666_v60 }
 0x2a4   :  { %2669 = vmatpush3.bf16.msra.mxu0 %v2666_v60  ;;  %2735 = vmatpush3.bf16.msra.mxu1 %v2666_v60 }
 0x2a5   :  { %2671 = vmatprep.subr.bf16.mxu1 %v2654_v39 }
 0x2a7   :  { %2459 = vmatmul.mubr.msk.f32.vlgmr.msra.gmra.mrb[4].mxu1 %vm301_vm1, %v3137_v63  ;;  %2447 = vmatmul.mubr.msk.f32.vlgmr.msra.gmra.mrb[8].mxu0 %vm301_vm1, %v3142_v0 }
 0x2a8   :  { %2673 = vmatpush3.bf16.msra.mxu1 %v2654_v39  ;;  %2461 = vmatprep.mubr.msk.f32.mxu1 %vm301_vm1, %v3147_v1 }
 0x2a9   :  { %2675 = vmatprep.subr.bf16.mxu1 %v2658_v44  ;;  %2449 = vmatprep.mubr.msk.f32.mxu0 %vm301_vm1, %v3152_v2 }
 0x2ab   :  { %2462 = vmatmul.mubr.msk.f32.gmra.mrb[6].mxu1 %vm301_vm1, %v3163_v3  ;;  %2450 = vmatmul.mubr.msk.f32.gmra.mrb[10].mxu0 %vm301_vm1, %v3168_v4 }
 0x2ac   :  { %2677 = vmatpush3.bf16.msra.mxu1 %v2658_v44  ;;  %2472 = vmatprep.mubr.msk.f32.mxu1 %vm301_vm1, %v3173_v5  ;;  %v3308_v44 = vpop.permute.xlu0 %231 }
 0x2ad   :  { %2452 = vmatprep.mubr.msk.f32.mxu0 %vm301_vm1, %v3180_v6  ;;  %3631 = vst [vmem:[#allocation6_spill] sm:$0xff] %v3308_v44 }
 0x2af   :  { %2473 = vmatmul.mubr.msk.f32.vlgmr.msra.gmra.mrb[8].mxu1 %vm301_vm1, %v3191_v7  ;;  %2453 = vmatmul.mubr.msk.f32.gmra.mrb[12].mxu0 %vm301_vm1, %v3196_v8 }
 0x2b0   :  { %2475 = vmatprep.mubr.msk.f32.mxu1 %vm301_vm1, %v3201_v9  ;;  %2455 = vmatprep.mubr.msk.f32.mxu0 %vm301_vm1, %v3208_v10 }
 0x2b3   :  { %2476 = vmatmul.mubr.msk.f32.gmra.mrb[10].mxu1 %vm301_vm1, %v3219_v11  ;;  %2456 = vmatmul.mubr.msk.f32.gmra.mrb[14].mxu0 %vm301_vm1, %v3226_v12 }
 0x2b4   :  { %2478 = vmatprep.mubr.msk.f32.mxu1 %vm301_vm1, %v3231_v13  ;;  %2498 = vmatprep.mubr.msk.f32.mxu0 %vm301_vm1, %v2176_v21 }
 0x2b7   :  { %2479 = vmatmul.mubr.msk.f32.gmra.mrb[12].mxu1 %vm301_vm1, %v3242_v14 }
 0x2b8   :  { %2481 = vmatprep.mubr.msk.f32.mxu1 %vm301_vm1, %v3247_v15 }
 0x2bb   :  { %2482 = vmatmul.mubr.msk.f32.gmra.mrb[14].mxu1 %vm301_vm1, %v3256_v16 }
 0x2bc   :  { %2484 = vmatprep.mubr.msk.f32.mxu1 %vm301_vm1, %v3261_v17 }
 0x2bf   :  { %2485 = vmatmul.mubr.msk.f32.gmra.mrb[16].mxu1 %vm301_vm1, %v3270_v18 }
 0x2c0   :  { %2487 = vmatprep.mubr.msk.f32.mxu1 %vm301_vm1, %v3275_v19 }
 0x2c3   :  { %2488 = vmatmul.mubr.msk.f32.gmra.mrb[18].mxu1 %vm301_vm1, %v3284_v20 }
 0x37a   :  { %v3296_v24 = vpop.f32.mrb[4].mxu1  ;;  %v2448_v25 = vpop.f32.mrb[8].mxu0 }
 0x37b   :  { %v3298_v26 = vpop.f32.mrb[5].mxu1  ;;  %v565_v27 = vpop.f32.mrb[9].mxu0 }
 0x37e   :  { %v3304_v30 = vpop.f32.mrb[6].mxu1  ;;  %v2451_v31 = vpop.f32.mrb[10].mxu0 }
 0x37f   :  { %v3306_v32 = vpop.f32.mrb[7].mxu1  ;;  %v575_v33 = vpop.f32.mrb[11].mxu0 }
 0x382   :  { %v2474_v34 = vpop.f32.mrb[8].mxu1  ;;  %v2454_v36 = vpop.f32.mrb[12].mxu0 }
 0x383   :  { %v786_v38 = vadd.f32 %v2474_v34, %v2448_v25  ;;  %v726_v39 = vpop.f32.mrb[9].mxu1  ;;  %v585_v40 = vpop.f32.mrb[13].mxu0 }
 0x384   :  { %v785_v42 = vadd.f32 %v726_v39, %v565_v27  ;;  %v3316_v27 = vpop.permute.xlu1 %246  ;;  %v3318_v39 = vpop.permute.xlu0 %241 }
 0x385   :  { %v794_v46 = vadd.f32 %v786_v38, %v3294_v23  ;;  %3633 = vst [vmem:[#allocation8_spill] sm:$0xff] %v3316_v27  ;;  %3634 = vst [vmem:[#allocation9_spill] sm:$0xff] %v3318_v39 }
 0x386   :  { %v793_v47 = vadd.f32 %v785_v42, %v3292_v22  ;;  %v2477_v49 = vpop.f32.mrb[10].mxu1  ;;  %v2457_v50 = vpop.f32.mrb[14].mxu0 }
 0x387   :  { %v2169_v51 = vmul.f32 -1.442695, %v794_v46  ;;  %v788_v52 = vadd.f32 %v2477_v49, %v2451_v31  ;;  %v736_v53 = vpop.f32.mrb[11].mxu1  ;;  %v595_v54 = vpop.f32.mrb[15].mxu0 }
 0x388   :  { %v2168_v57 = vmul.f32 -1.442695, %v793_v47  ;;  %v787_v58 = vadd.f32 %v736_v53, %v575_v33  ;;  %v3323_v53 = vpop.permute.xlu1 %284 }
 0x389   :  { %2768 = vpow2.f32 %v2169_v51  ;;  %v796_v59 = vadd.f32 %v788_v52, %v3302_v29  ;;  %3635 = vst [vmem:[#allocation10_spill] sm:$0xff] %v3323_v53 }
 0x38a   :  { %2770 = vpow2.f32 %v2168_v57  ;;  %v795_v60 = vadd.f32 %v787_v58, %v3300_v28  ;;  %v2480_v61 = vpop.f32.mrb[12].mxu1 }
 0x38b   :  { %v2171_v62 = vmul.f32 -1.442695, %v796_v59  ;;  %v790_v21 = vadd.f32 %v2480_v61, %v2454_v36  ;;  %v746_v25 = vpop.f32.mrb[13].mxu1  ;;  %v3326_v59 = vpop.permute.xlu0 %279 }
 0x38c   :  { %v2170_v34 = vmul.f32 -1.442695, %v795_v60  ;;  %v789_v38 = vadd.f32 %v746_v25, %v585_v40  ;;  %3636 = vst [vmem:[#allocation11_spill] sm:$0xff] %v3326_v59 }
 0x38d   :  { %2772 = vpow2.f32 %v2171_v62  ;;  %v798_v31 = vadd.f32 %v790_v21, %v3310_v45 }
 0x38e   :  { %2774 = vpow2.f32 %v2170_v34  ;;  %v797_v33 = vadd.f32 %v789_v38, %v3308_v44  ;;  %v2483_v42 = vpop.f32.mrb[14].mxu1 }
 0x38f   :  { %v2173_v46 = vmul.f32 -1.442695, %v798_v31  ;;  %v792_v47 = vadd.f32 %v2483_v42, %v2457_v50  ;;  %v756_v49 = vpop.f32.mrb[15].mxu1 }
 0x390   :  { %v2172_v51 = vmul.f32 -1.442695, %v797_v33  ;;  %v791_v52 = vadd.f32 %v756_v49, %v595_v54  ;;  %v3328_v33 = vpop.permute.xlu1 %260 }
 0x391   :  { %2776 = vpow2.f32 %v2173_v46  ;;  %v800_v36 = vadd.f32 %v792_v47, %v3316_v27  ;;  %v3330_v46 = vpop.permute.xlu0 %255 }
 0x392   :  { %2778 = vpow2.f32 %v2172_v51  ;;  %v799_v40 = vadd.f32 %v791_v52, %v3318_v39  ;;  %v2486_v57 = vpop.f32.mrb[16].mxu1  ;;  %v849_v39 = vadd.f32 %v3298_v26, %v3330_v46 }
 0x393   :  { %v2769_v58 = vpop.eup %2768  ;;  %v2175_v60 = vmul.f32 -1.442695, %v800_v36  ;;  %v766_v61 = vpop.f32.mrb[17].mxu1 }
 0x394   :  { %v2771_v62 = vpop.eup %2770  ;;  %v826_v21 = vadd.f32 1.0, %v2769_v58  ;;  %v2174_v50 = vmul.f32 -1.442695, %v799_v40  ;;  %v3332_v52 = vpop.permute.xlu1 %294 }
 0x395   :  { %v825_v25 = vadd.f32 1.0, %v2771_v62  ;;  %2780 = vpow2.f32 %v2175_v60  ;;  %v3334_v58 = vpop.permute.xlu0 %289  ;;  %v854_v62 = vadd.f32 %v2486_v57, %v3323_v53 }
 0x396   :  { %2782 = vrcp.f32 %v826_v21  ;;  %v2489_v54 = vpop.f32.mrb[18].mxu1 }
 0x397   :  { %v2773_v34 = vpop.eup %2772  ;;  %2784 = vrcp.f32 %v825_v25  ;;  %v776_v38 = vpop.f32.mrb[19].mxu1  ;;  %v856_v57 = vadd.f32 %v2489_v54, %v3332_v52 }
 0x398   :  { %v2775_v31 = vpop.eup %2774  ;;  %v828_v42 = vadd.f32 1.0, %v2773_v34  ;;  %2786 = vpow2.f32 %v2174_v50  ;;  %v853_v50 = vadd.f32 %v766_v61, %v3326_v59  ;;  %v855_v59 = vadd.f32 %v776_v38, %v3334_v58 }
 0x399   :  { %v827_v47 = vadd.f32 1.0, %v2775_v31  ;;  %v850_v31 = vadd.f32 %v3296_v24, %v3328_v33 }
 0x39a   :  { %2788 = vrcp.f32 %v828_v42 }
 0x39b   :  { %v2777_v49 = vpop.eup %2776  ;;  %2790 = vrcp.f32 %v827_v47 }
 0x39c   :  { %v2779_v51 = vpop.eup %2778  ;;  %v830_v36 = vadd.f32 1.0, %v2777_v49 }
 0x39d   :  { %v829_v60 = vadd.f32 1.0, %v2779_v51 }
 0x39e   :  { %2792 = vrcp.f32 %v830_v36 }
 0x39f   :  { %v2781_v40 = vpop.eup %2780  ;;  %2794 = vrcp.f32 %v829_v60 }
 0x3a0   :  { %v2783_v21 = vpop.eup %2782  ;;  %v832_v25 = vadd.f32 1.0, %v2781_v40  ;;  %v3343_v40 = vpop.permute.xlu1 %270 }
 0x3a1   :  { %v2785_v34 = vpop.eup %2784  ;;  %v858_v42 = vmul.f32 %v2783_v21, %v854_v62  ;;  %v3346_v62 = vpop.permute.xlu0 %265  ;;  %v852_v26 = vadd.f32 %v3304_v30, %v3343_v40 }
 0x3a2   :  { %v2787_v47 = vpop.eup %2786  ;;  %v857_v49 = vmul.f32 %v2785_v34, %v853_v50  ;;  %2796 = vrcp.f32 %v832_v25  ;;  %v851_v60 = vadd.f32 %v3306_v32, %v3346_v62 }
 0x3a3   :  { %v831_v27 = vadd.f32 1.0, %v2787_v47  ;;  %v862_v51 = vadd.f32 %v858_v42, %v850_v31 }
 0x3a4   :  { %v2789_v53 = vpop.eup %2788  ;;  %v861_v61 = vadd.f32 %v857_v49, %v849_v39 }
 0x3a5   :  { %v2791_v24 = vpop.eup %2790  ;;  %2798 = vrcp.f32 %v831_v27  ;;  %v860_v36 = vmul.f32 %v2789_v53, %v856_v57 }
 0x3a6   :  { %2800 = vtanh.f32 %v862_v51  ;;  %v859_v54 = vmul.f32 %v2791_v24, %v855_v59 }
 0x3a7   :  { %2802 = vtanh.f32 %v861_v61  ;;  %v864_v21 = vadd.f32 %v860_v36, %v852_v26 }
 0x3a8   :  { %v863_v50 = vadd.f32 %v859_v54, %v851_v60  ;;  %v2793_v39 = vpop.eup %2792 }
 0x3a9   :  { %2804 = vtanh.f32 %v864_v21  ;;  %v2795_v38 = vpop.eup %2794  ;;  %v870_v31 = vsub.f32 1.0, %v2793_v39  ;;  %v878_v53 = vmul.f32 %v2793_v39, %v3087_v35 }
 0x3aa   :  { %2806 = vtanh.f32 %v863_v50  ;;  %v869_v47 = vsub.f32 1.0, %v2795_v38  ;;  %v877_v32 = vmul.f32 %v2795_v38, %v3089_v37  ;;  %v2179_v38 = vld [vmem:[%s3609_s4 + $0x38] sm:$0xff] }
 0x3ac   :  { %v2797_v25 = vpop.eup %2796 }
 0x3ad   :  { %v872_v59 = vsub.f32 1.0, %v2797_v25  ;;  %v880_v60 = vmul.f32 %v2797_v25, %v3093_v41  ;;  %v2177_v41 = vld [vmem:[%s3609_s4 + $0x28] sm:$0xff] }
 0x3af   :  { %v2799_v34 = vpop.eup %2798 }
 0x3b0   :  { %v2801_v42 = vpop.eup %2800  ;;  %v871_v61 = vsub.f32 1.0, %v2799_v34  ;;  %v879_v21 = vmul.f32 %v2799_v34, %v3095_v43  ;;  %v2178_v43 = vld [vmem:[%s3609_s4 + $0x30] sm:$0xff] }
 0x3b1   :  { %v2803_v30 = vpop.eup %2802  ;;  %v874_v27 = vmul.f32 %v2801_v42, %v870_v31 }
 0x3b2   :  { %v873_v49 = vmul.f32 %v2803_v30, %v869_v47 }
 0x3b3   :  { %v2805_v51 = vpop.eup %2804  ;;  %v3354_v57 = vadd.f32 %v878_v53, %v874_v27 }
 0x3b4   :  { %v2807_v24 = vpop.eup %2806  ;;  %v3356_v26 = vadd.f32 %v877_v32, %v873_v49  ;;  %v876_v36 = vmul.f32 %v2805_v51, %v872_v59 }
 0x3b5   :  { %v875_v54 = vmul.f32 %v2807_v24, %v871_v61  ;;  %v2218_v61 = vld [vmem:[%s3609_s4 + $0x40] sm:$0xff] }
 0x3b6   :  { %v2678_v35 = vpack.c.bf16 %v3354_v57, %v3356_v26  ;;  %v3362_v50 = vadd.f32 %v880_v60, %v876_v36  ;;  %2570 = vmatprep.mubr.msk.f32.mxu1 %vm301_vm1, %v2218_v61 }
 0x3b7   :  { %v3364_v37 = vadd.f32 %v879_v21, %v875_v54 }
 0x3b8   :  { %2679 = vmatprep.subr.bf16.mxu0 %v2678_v35 }
 0x3b9   :  { %2681 = vmatpush3.bf16.msra.mxu0 %v2678_v35  ;;  %v2682_v39 = vpack.c.bf16 %v3362_v50, %v3364_v37 }
 0x3bb   :  { %2683 = vmatprep.subr.bf16.mxu0 %v2682_v39 }
 0x3bd   :  { %2685 = vmatpush3.bf16.msra.mxu0 %v2682_v39 }
 0x3be   :  { %2504 = vmatprep.subr.bf16.mxu0 %v3114_v48 }
 0x3c0   :  { %2499 = vmatmul.mubr.msk.f32.vlgmr.msra.gmra.mrb[16].mxu0 %vm301_vm1, %v2177_v41 }
 0x3c1   :  { %2501 = vmatprep.mubr.msk.f32.mxu0 %vm301_vm1, %v2178_v43  ;;  %2505 = vmatpush3.bf16.msra.mxu0 %v3114_v48 }
 0x3c4   :  { %2502 = vmatmul.mubr.msk.f32.gmra.mrb[18].mxu0 %vm301_vm1, %v2179_v38 }
 0x493   :  { %v2500_v25 = vpop.f32.mrb[16].mxu0 }
 0x494   :  { %v968_v34 = vpop.f32.mrb[17].mxu0 }
 0x495   :  { %v987_v31 = vpack.c.bf16 %v2500_v25, %v968_v34 }
 0x497   :  { %v2503_v42 = vpop.f32.mrb[18].mxu0  ;;  %2506 = vmatprep.mubr.msk.bf16.mxu0 %vm407_vm2, %v987_v31 }
 0x498   :  { %v978_v47 = vpop.f32.mrb[19].mxu0 }
 0x499   :  { %v988_v30 = vpack.c.bf16 %v2503_v42, %v978_v47 }
 0x49b   :  { %2507 = vmatmul.mubr.msk.bf16.vlgmr.msra.gmra.mrb[20].mxu0 %vm407_vm2, %v988_v30 }
 0x49c   :  { %2518 = vmatprep.mubr.msk.f32.mxu0 %vm301_vm1, %v3130_v56 }
 0x56e   :  { %v2508_v27 = vpop.f32.mrb[20].mxu0 }
 0x56f   :  { %v1029_v53 = vpop.f32.mrb[21].mxu0 }
 0x570   :  { %v2509_v49 = vpop.f32.mrb[22].mxu0 }
 0x571   :  { %v2690_v32 = vpack.c.bf16 %v2509_v49, %v2508_v27  ;;  %v1032_v59 = vpop.f32.mrb[23].mxu0 }
 0x572   :  { %v2686_v51 = vpack.c.bf16 %v1032_v59, %v1029_v53 }
 0x574   :  { %2687 = vmatprep.subr.bf16.mxu0 %v2686_v51 }
 0x575   :  { %2689 = vmatpush3.bf16.msra.mxu0 %v2686_v51 }
 0x576   :  { %2691 = vmatprep.subr.bf16.mxu0 %v2690_v32 }
 0x579   :  { %2693 = vmatpush3.bf16.msra.mxu0 %v2690_v32 }
 0x57a   :  { %2695 = vmatprep.subr.bf16.mxu0 %v2678_v35 }
 0x57c   :  { %2519 = vmatmul.mubr.msk.f32.vlgmr.msra.gmra.mrb[24].mxu0 %vm301_vm1, %v3142_v0 }
 0x57d   :  { %2697 = vmatpush3.bf16.msra.mxu0 %v2678_v35  ;;  %2521 = vmatprep.mubr.msk.f32.mxu0 %vm301_vm1, %v3152_v2 }
 0x57e   :  { %2699 = vmatprep.subr.bf16.mxu0 %v2682_v39 }
 0x580   :  { %2522 = vmatmul.mubr.msk.f32.gmra.mrb[26].mxu0 %vm301_vm1, %v3168_v4 }
 0x581   :  { %2701 = vmatpush3.bf16.msra.mxu0 %v2682_v39  ;;  %2524 = vmatprep.mubr.msk.f32.mxu0 %vm301_vm1, %v3180_v6 }
 0x584   :  { %2525 = vmatmul.mubr.msk.f32.gmra.mrb[28].mxu0 %vm301_vm1, %v3196_v8 }
 0x585   :  { %2527 = vmatprep.mubr.msk.f32.mxu0 %vm301_vm1, %v3208_v10 }
 0x588   :  { %2528 = vmatmul.mubr.msk.f32.gmra.mrb[30].mxu0 %vm301_vm1, %v3226_v12 }
 0x589   :  { %2530 = vmatprep.mubr.msk.f32.mxu0 %vm301_vm1, %v3123_v55 }
 0x58c   :  { %2531 = vmatmul.mubr.msk.f32.gmra.mrb[32].mxu0 %vm301_vm1, %v3137_v63 }
 0x58d   :  { %2533 = vmatprep.mubr.msk.f32.mxu0 %vm301_vm1, %v3147_v1 }
 0x590   :  { %2534 = vmatmul.mubr.msk.f32.gmra.mrb[34].mxu0 %vm301_vm1, %v3163_v3 }
 0x591   :  { %2544 = vmatprep.mubr.msk.f32.mxu0 %vm301_vm1, %v3173_v5 }
 0x594   :  { %2545 = vmatmul.mubr.msk.f32.vlgmr.msra.gmra.mrb[24].mxu0 %vm301_vm1, %v3191_v7 }
 0x595   :  { %2547 = vmatprep.mubr.msk.f32.mxu0 %vm301_vm1, %v3201_v9 }
 0x598   :  { %2548 = vmatmul.mubr.msk.f32.gmra.mrb[26].mxu0 %vm301_vm1, %v3219_v11 }
 0x599   :  { %2550 = vmatprep.mubr.msk.f32.mxu0 %vm301_vm1, %v3231_v13 }
 0x59c   :  { %2551 = vmatmul.mubr.msk.f32.gmra.mrb[28].mxu0 %vm301_vm1, %v3242_v14 }
 0x59d   :  { %2553 = vmatprep.mubr.msk.f32.mxu0 %vm301_vm1, %v3247_v15 }
 0x5a0   :  { %2554 = vmatmul.mubr.msk.f32.gmra.mrb[30].mxu0 %vm301_vm1, %v3256_v16 }
 0x5a1   :  { %2556 = vmatprep.mubr.msk.f32.mxu0 %vm301_vm1, %v3261_v17 }
 0x5a4   :  { %2557 = vmatmul.mubr.msk.f32.gmra.mrb[36].mxu0 %vm301_vm1, %v3270_v18 }
 0x5a5   :  { %2559 = vmatprep.mubr.msk.f32.mxu0 %vm301_vm1, %v3275_v19 }
 0x5a8   :  { %2560 = vmatmul.mubr.msk.f32.gmra.mrb[38].mxu0 %vm301_vm1, %v3284_v20 }
 0x65f   :  { %v2532_v24 = vpop.f32.mrb[32].mxu0 }
 0x660   :  { %v3436_v36 = vpop.f32.mrb[33].mxu0 }
 0x663   :  { %v3438_v60 = vpop.f32.mrb[34].mxu0 }
 0x664   :  { %v3440_v54 = vpop.f32.mrb[35].mxu0 }
 0x667   :  { %v2546_v21 = vpop.f32.mrb[24].mxu0 }
 0x668   :  { %v1303_v35 = vadd.f32 %v2546_v21, %v3294_v23  ;;  %v1235_v39 = vpop.f32.mrb[25].mxu0  ;;  %v3637_v21 = vld [vmem:[#allocation8_spill] sm:$0xff] }
 0x669   :  { %v1302_v41 = vadd.f32 %v1235_v39, %v3292_v22 }
 0x66a   :  { %v2211_v43 = vmul.f32 -1.442695, %v1303_v35 }
 0x66b   :  { %v2210_v38 = vmul.f32 -1.442695, %v1302_v41  ;;  %v2549_v25 = vpop.f32.mrb[26].mxu0  ;;  %v3638_v41 = vld [vmem:[#allocation9_spill] sm:$0xff] }
 0x66c   :  { %2808 = vpow2.f32 %v2211_v43  ;;  %v1305_v34 = vadd.f32 %v2549_v25, %v3302_v29  ;;  %v1245_v31 = vpop.f32.mrb[27].mxu0 }
 0x66d   :  { %2810 = vpow2.f32 %v2210_v38  ;;  %v1304_v42 = vadd.f32 %v1245_v31, %v3300_v28 }
 0x66e   :  { %v2213_v47 = vmul.f32 -1.442695, %v1305_v34 }
 0x66f   :  { %v2212_v30 = vmul.f32 -1.442695, %v1304_v42  ;;  %v2552_v27 = vpop.f32.mrb[28].mxu0 }
 0x670   :  { %2812 = vpow2.f32 %v2213_v47  ;;  %v1307_v53 = vadd.f32 %v2552_v27, %v3310_v45  ;;  %v1255_v49 = vpop.f32.mrb[29].mxu0 }
 0x671   :  { %2814 = vpow2.f32 %v2212_v30  ;;  %v1306_v32 = vadd.f32 %v1255_v49, %v3308_v44 }
 0x672   :  { %v2215_v59 = vmul.f32 -1.442695, %v1307_v53 }
 0x673   :  { %v2214_v51 = vmul.f32 -1.442695, %v1306_v32  ;;  %v2555_v61 = vpop.f32.mrb[30].mxu0 }
 0x674   :  { %2816 = vpow2.f32 %v2215_v59  ;;  %v1309_v35 = vadd.f32 %v2555_v61, %v3637_v21  ;;  %v1265_v39 = vpop.f32.mrb[31].mxu0  ;;  %v3639_v21 = vld [vmem:[#allocation10_spill] sm:$0xff] }
 0x675   :  { %2818 = vpow2.f32 %v2214_v51  ;;  %v1308_v43 = vadd.f32 %v1265_v39, %v3638_v41 }
 0x676   :  { %v2809_v38 = vpop.eup %2808  ;;  %v2217_v25 = vmul.f32 -1.442695, %v1309_v35 }
 0x677   :  { %v2811_v34 = vpop.eup %2810  ;;  %v1335_v31 = vadd.f32 1.0, %v2809_v38  ;;  %v2216_v42 = vmul.f32 -1.442695, %v1308_v43  ;;  %v2558_v47 = vpop.f32.mrb[36].mxu0 }
 0x678   :  { %v1334_v27 = vadd.f32 1.0, %v2811_v34  ;;  %2820 = vpow2.f32 %v2217_v25  ;;  %v1275_v30 = vpop.f32.mrb[37].mxu0  ;;  %v1363_v34 = vadd.f32 %v2558_v47, %v3639_v21 }
 0x679   :  { %2822 = vrcp.f32 %v1335_v31  ;;  %v3640_v31 = vld [vmem:[#allocation11_spill] sm:$0xff] }
 0x67a   :  { %v2813_v53 = vpop.eup %2812  ;;  %2824 = vrcp.f32 %v1334_v27  ;;  %v1362_v45 = vadd.f32 %v1275_v30, %v3640_v31 }
 0x67b   :  { %v2815_v49 = vpop.eup %2814  ;;  %v1337_v32 = vadd.f32 1.0, %v2813_v53  ;;  %2826 = vpow2.f32 %v2216_v42  ;;  %v2561_v59 = vpop.f32.mrb[38].mxu0  ;;  %v1359_v53 = vadd.f32 %v2532_v24, %v3328_v33  ;;  %v1361_v24 = vadd.f32 %v3438_v60, %v3343_v40 }
 0x67c   :  { %v1336_v61 = vadd.f32 1.0, %v2815_v49  ;;  %v1285_v51 = vpop.f32.mrb[39].mxu0  ;;  %v1358_v49 = vadd.f32 %v3436_v36, %v3330_v46  ;;  %v1360_v36 = vadd.f32 %v3440_v54, %v3346_v62 }
 0x67d   :  { %2828 = vrcp.f32 %v1337_v32  ;;  %v1364_v30 = vadd.f32 %v1285_v51, %v3334_v58 }
 0x67e   :  { %v2817_v39 = vpop.eup %2816  ;;  %2830 = vrcp.f32 %v1336_v61 }
 0x67f   :  { %v2819_v35 = vpop.eup %2818  ;;  %v1339_v41 = vadd.f32 1.0, %v2817_v39 }
 0x680   :  { %v1338_v43 = vadd.f32 1.0, %v2819_v35  ;;  %v1365_v35 = vadd.f32 %v2561_v59, %v3332_v52 }
 0x681   :  { %2832 = vrcp.f32 %v1339_v41 }
 0x682   :  { %v2821_v38 = vpop.eup %2820  ;;  %2834 = vrcp.f32 %v1338_v43 }
 0x683   :  { %v2823_v25 = vpop.eup %2822  ;;  %v1341_v44 = vadd.f32 1.0, %v2821_v38 }
 0x684   :  { %v2825_v27 = vpop.eup %2824  ;;  %v1367_v42 = vmul.f32 %v2823_v25, %v1363_v34 }
 0x685   :  { %v2827_v28 = vpop.eup %2826  ;;  %v1366_v32 = vmul.f32 %v2825_v27, %v1362_v45  ;;  %2836 = vrcp.f32 %v1341_v44 }
 0x686   :  { %v1340_v61 = vadd.f32 1.0, %v2827_v28  ;;  %v1371_v39 = vadd.f32 %v1367_v42, %v1359_v53 }
 0x687   :  { %v2829_v47 = vpop.eup %2828  ;;  %v1370_v38 = vadd.f32 %v1366_v32, %v1358_v49 }
 0x688   :  { %v2831_v31 = vpop.eup %2830  ;;  %2838 = vrcp.f32 %v1340_v61  ;;  %v1369_v34 = vmul.f32 %v2829_v47, %v1365_v35 }
 0x689   :  { %2840 = vtanh.f32 %v1371_v39  ;;  %v1368_v45 = vmul.f32 %v2831_v31, %v1364_v30 }
 0x68a   :  { %2842 = vtanh.f32 %v1370_v38  ;;  %v1373_v28 = vadd.f32 %v1369_v34, %v1361_v24 }
 0x68b   :  { %v1372_v41 = vadd.f32 %v1368_v45, %v1360_v36  ;;  %v2833_v44 = vpop.eup %2832 }
 0x68c   :  { %2844 = vtanh.f32 %v1373_v28  ;;  %v2835_v59 = vpop.eup %2834  ;;  %v1379_v25 = vsub.f32 1.0, %v2833_v44  ;;  %v1387_v49 = vmul.f32 %v2833_v44, %v3354_v57 }
 0x68d   :  { %2846 = vtanh.f32 %v1372_v41  ;;  %v1378_v53 = vsub.f32 1.0, %v2835_v59  ;;  %v1386_v54 = vmul.f32 %v2835_v59, %v3356_v26  ;;  %v2221_v41 = vld [vmem:[%s3609_s4 + $0x58] sm:$0xff] }
 0x68f   :  { %v2837_v43 = vpop.eup %2836 }
 0x690   :  { %v1381_v31 = vsub.f32 1.0, %v2837_v43  ;;  %v1389_v24 = vmul.f32 %v2837_v43, %v3362_v50  ;;  %v2219_v50 = vld [vmem:[%s3609_s4 + $0x48] sm:$0xff] }
 0x692   :  { %v2839_v51 = vpop.eup %2838 }
 0x693   :  { %v2841_v27 = vpop.eup %2840  ;;  %v1380_v35 = vsub.f32 1.0, %v2839_v51  ;;  %v1388_v36 = vmul.f32 %v2839_v51, %v3364_v37  ;;  %v2220_v37 = vld [vmem:[%s3609_s4 + $0x50] sm:$0xff] }
 0x694   :  { %v2843_v60 = vpop.eup %2842  ;;  %v1383_v42 = vmul.f32 %v2841_v27, %v1379_v25 }
 0x695   :  { %v1382_v32 = vmul.f32 %v2843_v60, %v1378_v53 }
 0x696   :  { %v2845_v61 = vpop.eup %2844  ;;  %v3463_v39 = vadd.f32 %v1387_v49, %v1383_v42 }
 0x697   :  { %v2847_v47 = vpop.eup %2846  ;;  %v3465_v38 = vadd.f32 %v1386_v54, %v1382_v32  ;;  %v1385_v30 = vmul.f32 %v2845_v61, %v1381_v31  ;;  %v3644_v61 = vld [vmem:[#allocation8_spill] sm:$0xff] }
 0x698   :  { %v1384_v34 = vmul.f32 %v2847_v47, %v1380_v35  ;;  %v3645_v47 = vld [vmem:[#allocation9_spill] sm:$0xff] }
 0x699   :  { %v2702_v57 = vpack.c.bf16 %v3463_v39, %v3465_v38  ;;  %v3471_v45 = vadd.f32 %v1389_v24, %v1385_v30 }
 0x69a   :  { %v3473_v26 = vadd.f32 %v1388_v36, %v1384_v34 }
 0x69b   :  { %2703 = vmatprep.subr.bf16.mxu1 %v2702_v57 }
 0x69c   :  { %2705 = vmatpush3.bf16.msra.mxu1 %v2702_v57  ;;  %v2706_v28 = vpack.c.bf16 %v3471_v45, %v3473_v26 }
 0x69e   :  { %2707 = vmatprep.subr.bf16.mxu1 %v2706_v28 }
 0x6a0   :  { %2709 = vmatpush3.bf16.msra.mxu1 %v2706_v28 }
 0x6a1   :  { %2576 = vmatprep.subr.bf16.mxu1 %v3114_v48 }
 0x6a3   :  { %2571 = vmatmul.mubr.msk.f32.vlgmr.msra.gmra.mrb[20].mxu1 %vm301_vm1, %v2219_v50 }
 0x6a4   :  { %2573 = vmatprep.mubr.msk.f32.mxu1 %vm301_vm1, %v2220_v37  ;;  %2577 = vmatpush3.bf16.msra.mxu1 %v3114_v48 }
 0x6a7   :  { %2574 = vmatmul.mubr.msk.f32.gmra.mrb[22].mxu1 %vm301_vm1, %v2221_v41 }
 0x776   :  { %v2572_v44 = vpop.f32.mrb[20].mxu1 }
 0x777   :  { %v1477_v59 = vpop.f32.mrb[21].mxu1 }
 0x778   :  { %v1496_v43 = vpack.c.bf16 %v2572_v44, %v1477_v59 }
 0x77a   :  { %v2575_v51 = vpop.f32.mrb[22].mxu1  ;;  %2578 = vmatprep.mubr.msk.bf16.mxu1 %vm407_vm2, %v1496_v43 }
 0x77b   :  { %v1487_v25 = vpop.f32.mrb[23].mxu1 }
 0x77c   :  { %v1497_v27 = vpack.c.bf16 %v2575_v51, %v1487_v25 }
 0x77e   :  { %2579 = vmatmul.mubr.msk.bf16.vlgmr.msra.gmra.mrb[24].mxu1 %vm407_vm2, %v1497_v27 }
 0x77f   :  { %2590 = vmatprep.mubr.msk.f32.mxu1 %vm301_vm1, %v3130_v56  ;;  %v2923_v56 = vmov 0.0  }
 0x780   :  { %2642 = vmatprep.mubr.msk.f32.mxu0 %vm2922_vm3, %v2923_v56 }
 0x851   :  { %v2580_v53 = vpop.f32.mrb[24].mxu1 }
 0x852   :  { %v1538_v60 = vpop.f32.mrb[25].mxu1 }
 0x853   :  { %v2581_v42 = vpop.f32.mrb[26].mxu1 }
 0x854   :  { %v2714_v49 = vpack.c.bf16 %v2581_v42, %v2580_v53  ;;  %v1541_v48 = vpop.f32.mrb[27].mxu1 }
 0x855   :  { %v2710_v32 = vpack.c.bf16 %v1541_v48, %v1538_v60 }
 0x857   :  { %2711 = vmatprep.subr.bf16.mxu1 %v2710_v32 }
 0x858   :  { %2713 = vmatpush3.bf16.msra.mxu1 %v2710_v32 }
 0x859   :  { %2715 = vmatprep.subr.bf16.mxu1 %v2714_v49 }
 0x85c   :  { %2717 = vmatpush3.bf16.msra.mxu1 %v2714_v49 }
 0x85d   :  { %2719 = vmatprep.subr.bf16.mxu1 %v2702_v57 }
 0x85f   :  { %2591 = vmatmul.mubr.msk.f32.vlgmr.msra.gmra.mrb[28].mxu1 %vm301_vm1, %v3142_v0 }
 0x860   :  { %2721 = vmatpush3.bf16.msra.mxu1 %v2702_v57  ;;  %2593 = vmatprep.mubr.msk.f32.mxu1 %vm301_vm1, %v3152_v2 }
 0x861   :  { %2723 = vmatprep.subr.bf16.mxu1 %v2706_v28 }
 0x863   :  { %2594 = vmatmul.mubr.msk.f32.gmra.mrb[30].mxu1 %vm301_vm1, %v3168_v4 }
 0x864   :  { %2725 = vmatpush3.bf16.msra.mxu1 %v2706_v28  ;;  %2596 = vmatprep.mubr.msk.f32.mxu1 %vm301_vm1, %v3180_v6 }
 0x867   :  { %2597 = vmatmul.mubr.msk.f32.gmra.mrb[32].mxu1 %vm301_vm1, %v3196_v8 }
 0x868   :  { %2599 = vmatprep.mubr.msk.f32.mxu1 %vm301_vm1, %v3208_v10 }
 0x86b   :  { %2600 = vmatmul.mubr.msk.f32.gmra.mrb[34].mxu1 %vm301_vm1, %v3226_v12  ;;  %v3641_v12 = vld [vmem:[#allocation5_spill] sm:$0xff] }
 0x86c   :  { %2602 = vmatprep.mubr.msk.f32.mxu1 %vm301_vm1, %v3123_v55  ;;  %v2921_v55 = vmov 0.0|0.0  }
 0x86d   :  { %2726 = vmatprep.subr.bf16.mxu0 %v2921_v55 }
 0x86f   :  { %2603 = vmatmul.mubr.msk.f32.gmra.mrb[36].mxu1 %vm301_vm1, %v3137_v63 }
 0x870   :  { %2605 = vmatprep.mubr.msk.f32.mxu1 %vm301_vm1, %v3147_v1 }
 0x873   :  { %2606 = vmatmul.mubr.msk.f32.gmra.mrb[38].mxu1 %vm301_vm1, %v3163_v3 }
 0x874   :  { %2616 = vmatprep.mubr.msk.f32.mxu1 %vm301_vm1, %v3173_v5 }
 0x877   :  { %2617 = vmatmul.mubr.msk.f32.vlgmr.msra.gmra.mrb[28].mxu1 %vm301_vm1, %v3191_v7 }
 0x878   :  { %2619 = vmatprep.mubr.msk.f32.mxu1 %vm301_vm1, %v3201_v9 }
 0x87b   :  { %2620 = vmatmul.mubr.msk.f32.gmra.mrb[30].mxu1 %vm301_vm1, %v3219_v11 }
 0x87c   :  { %2622 = vmatprep.mubr.msk.f32.mxu1 %vm301_vm1, %v3231_v13 }
 0x87f   :  { %2623 = vmatmul.mubr.msk.f32.gmra.mrb[32].mxu1 %vm301_vm1, %v3242_v14 }
 0x880   :  { %2625 = vmatprep.mubr.msk.f32.mxu1 %vm301_vm1, %v3247_v15 }
 0x883   :  { %2626 = vmatmul.mubr.msk.f32.gmra.mrb[34].mxu1 %vm301_vm1, %v3256_v16 }
 0x884   :  { %2628 = vmatprep.mubr.msk.f32.mxu1 %vm301_vm1, %v3261_v17  ;;  %v3642_v17 = vld [vmem:[#allocation7_spill] sm:$0xff] }
 0x887   :  { %2629 = vmatmul.mubr.msk.f32.gmra.mrb[40].mxu1 %vm301_vm1, %v3270_v18 }
 0x888   :  { %2631 = vmatprep.mubr.msk.f32.mxu1 %vm301_vm1, %v3275_v19 }
 0x88b   :  { %2632 = vmatmul.mubr.msk.f32.gmra.mrb[42].mxu1 %vm301_vm1, %v3284_v20  ;;  %v3643_v20 = vld [vmem:[#allocation6_spill] sm:$0xff] }
 0x942   :  { %v2604_v63 = vpop.f32.mrb[36].mxu1 }
 0x943   :  { %v3544_v0 = vpop.f32.mrb[37].mxu1 }
 0x946   :  { %v3546_v1 = vpop.f32.mrb[38].mxu1 }
 0x947   :  { %v3548_v2 = vpop.f32.mrb[39].mxu1 }
 0x94a   :  { %v2618_v3 = vpop.f32.mrb[28].mxu1 }
 0x94b   :  { %v1812_v4 = vadd.f32 %v2618_v3, %v3294_v23  ;;  %v1744_v5 = vpop.f32.mrb[29].mxu1 }
 0x94c   :  { %v1811_v6 = vadd.f32 %v1744_v5, %v3292_v22  ;;  %v3646_v5 = vld [vmem:[#allocation11_spill] sm:$0xff] }
 0x94d   :  { %v2253_v7 = vmul.f32 -1.442695, %v1812_v4 }
 0x94e   :  { %v2252_v8 = vmul.f32 -1.442695, %v1811_v6  ;;  %v2621_v9 = vpop.f32.mrb[30].mxu1 }
 0x94f   :  { %2848 = vpow2.f32 %v2253_v7  ;;  %v1814_v10 = vadd.f32 %v2621_v9, %v3302_v29  ;;  %v1754_v11 = vpop.f32.mrb[31].mxu1 }
 0x950   :  { %2850 = vpow2.f32 %v2252_v8  ;;  %v1813_v13 = vadd.f32 %v1754_v11, %v3641_v12  ;;  %v1868_v8 = vadd.f32 %v2604_v63, %v3328_v33  ;;  %v1867_v11 = vadd.f32 %v3544_v0, %v3330_v46 }
 0x951   :  { %v2255_v14 = vmul.f32 -1.442695, %v1814_v10  ;;  %v1870_v33 = vadd.f32 %v3546_v1, %v3343_v40  ;;  %v1869_v46 = vadd.f32 %v3548_v2, %v3346_v62 }
 0x952   :  { %v2254_v15 = vmul.f32 -1.442695, %v1813_v13  ;;  %v2624_v16 = vpop.f32.mrb[32].mxu1 }
 0x953   :  { %2852 = vpow2.f32 %v2255_v14  ;;  %v1816_v18 = vadd.f32 %v2624_v16, %v3642_v17  ;;  %v1764_v19 = vpop.f32.mrb[33].mxu1 }
 0x954   :  { %2854 = vpow2.f32 %v2254_v15  ;;  %v1815_v22 = vadd.f32 %v1764_v19, %v3643_v20 }
 0x955   :  { %v2257_v23 = vmul.f32 -1.442695, %v1816_v18 }
 0x956   :  { %v2256_v54 = vmul.f32 -1.442695, %v1815_v22  ;;  %v2627_v31 = vpop.f32.mrb[34].mxu1 }
 0x957   :  { %2856 = vpow2.f32 %v2257_v23  ;;  %v1818_v29 = vadd.f32 %v2627_v31, %v3644_v61  ;;  %v1774_v35 = vpop.f32.mrb[35].mxu1 }
 0x958   :  { %2858 = vpow2.f32 %v2256_v54  ;;  %v1817_v30 = vadd.f32 %v1774_v35, %v3645_v47 }
 0x959   :  { %v2849_v24 = vpop.eup %2848  ;;  %v2259_v34 = vmul.f32 -1.442695, %v1818_v29 }
 0x95a   :  { %v2851_v36 = vpop.eup %2850  ;;  %v1844_v57 = vadd.f32 1.0, %v2849_v24  ;;  %v2258_v28 = vmul.f32 -1.442695, %v1817_v30  ;;  %v2630_v50 = vpop.f32.mrb[40].mxu1 }
 0x95b   :  { %v1843_v37 = vadd.f32 1.0, %v2851_v36  ;;  %2860 = vpow2.f32 %v2259_v34  ;;  %v1784_v41 = vpop.f32.mrb[41].mxu1  ;;  %v1872_v32 = vadd.f32 %v2630_v50, %v3639_v21 }
 0x95c   :  { %2862 = vrcp.f32 %v1844_v57  ;;  %v1871_v6 = vadd.f32 %v1784_v41, %v3646_v5 }
 0x95d   :  { %v2853_v44 = vpop.eup %2852  ;;  %2864 = vrcp.f32 %v1843_v37 }
 0x95e   :  { %v2855_v59 = vpop.eup %2854  ;;  %v1846_v43 = vadd.f32 1.0, %v2853_v44  ;;  %2866 = vpow2.f32 %v2258_v28  ;;  %v2633_v51 = vpop.f32.mrb[42].mxu1 }
 0x95f   :  { %v1845_v25 = vadd.f32 1.0, %v2855_v59  ;;  %v1794_v27 = vpop.f32.mrb[43].mxu1  ;;  %v1874_v15 = vadd.f32 %v2633_v51, %v3332_v52  ;;  %v1909_v51 = vpop.permute.xlu0 %1908 }
 0x960   :  { %2868 = vrcp.f32 %v1846_v43  ;;  %v1873_v17 = vadd.f32 %v1794_v27, %v3334_v58  ;;  %v1903_v43 = vld [vmem:[%s3617_s12] sm:$0x3] }
 0x961   :  { %v2857_v53 = vpop.eup %2856  ;;  %2870 = vrcp.f32 %v1845_v25  ;;  %vm1984_vm4 = vcmp.gt.f32.partialorder %v1903_v43, 0.0 }
 0x962   :  { %v2859_v60 = vpop.eup %2858  ;;  %v1848_v42 = vadd.f32 1.0, %v2857_v53 }
 0x963   :  { %v1847_v48 = vadd.f32 1.0, %v2859_v60 }
 0x964   :  { %2872 = vrcp.f32 %v1848_v42 }
 0x965   :  { %v2861_v49 = vpop.eup %2860  ;;  %2874 = vrcp.f32 %v1847_v48 }
 0x966   :  { %v2863_v3 = vpop.eup %2862  ;;  %v1850_v4 = vadd.f32 1.0, %v2861_v49 }
 0x967   :  { %v2865_v7 = vpop.eup %2864  ;;  %v1876_v9 = vmul.f32 %v2863_v3, %v1872_v32 }
 0x968   :  { %v2867_v10 = vpop.eup %2866  ;;  %v1875_v12 = vmul.f32 %v2865_v7, %v1871_v6  ;;  %2876 = vrcp.f32 %v1850_v4 }
 0x969   :  { %v1849_v13 = vadd.f32 1.0, %v2867_v10  ;;  %v1880_v14 = vadd.f32 %v1876_v9, %v1868_v8 }
 0x96a   :  { %v2869_v21 = vpop.eup %2868  ;;  %v1879_v16 = vadd.f32 %v1875_v12, %v1867_v11 }
 0x96b   :  { %v2871_v18 = vpop.eup %2870  ;;  %2878 = vrcp.f32 %v1849_v13  ;;  %v1878_v63 = vmul.f32 %v2869_v21, %v1874_v15 }
 0x96c   :  { %2880 = vtanh.f32 %v1880_v14  ;;  %v1877_v0 = vmul.f32 %v2871_v18, %v1873_v17 }
 0x96d   :  { %2882 = vtanh.f32 %v1879_v16  ;;  %v1882_v19 = vadd.f32 %v1878_v63, %v1870_v33 }
 0x96e   :  { %v1881_v20 = vadd.f32 %v1877_v0, %v1869_v46  ;;  %v2873_v52 = vpop.eup %2872 }
 0x96f   :  { %2884 = vtanh.f32 %v1882_v19  ;;  %v2875_v22 = vpop.eup %2874  ;;  %v1888_v54 = vsub.f32 1.0, %v2873_v52  ;;  %v1896_v29 = vmul.f32 %v2873_v52, %v3463_v39 }
 0x970   :  { %2886 = vtanh.f32 %v1881_v20  ;;  %v1887_v61 = vsub.f32 1.0, %v2875_v22  ;;  %v1895_v62 = vmul.f32 %v2875_v22, %v3465_v38  ;;  %v1904_v38 = vld [vmem:[%s3615_s10] sm:$0x7]  ;;  %s2924_s10 = smov [#allocation2]  }
 0x971   :  { %s2125_s12 = sshll.u32 %s2924_s10, 4  ;;  %s2126_s12 = int_to_ptr.vmem [resolvable:$true] %s2125_s12 }
 0x972   :  { %v2877_v23 = vpop.eup %2876  ;;  %s2896_s0 = scalar_lea.vmem %s2126_s12, 32  ;;  %p2901_p1 = scmp.lt.s32.totalorder %s2126_s12, %s2126_s12 }
 0x973   :  { %v1890_v2 = vsub.f32 1.0, %v2877_v23  ;;  %v1898_v28 = vmul.f32 %v2877_v23, %v3471_v45  ;;  %v1985_v45 = vlaneseq  ;;  %p2897_p0 = scmp.ne.s32.totalorder %s2126_s12, %s2896_s0  ;;  %p2902_p2 = scmp.lt.s32.totalorder %s2896_s0, %s2896_s0 }
 0x975   :  { %v2879_v58 = vpop.eup %2878  ;;  %p2903_p3 = por %p2902_p2, %p2901_p1 }
 0x976   :  { %v2881_v31 = vpop.eup %2880  ;;  %v1889_v24 = vsub.f32 1.0, %v2879_v58  ;;  %v1897_v37 = vmul.f32 %v2879_v58, %v3473_v26  ;;  %v1986_v26 = vshrl.u32 %v1985_v45, 7 }
 0x977   :  { %v2883_v40 = vpop.eup %2882  ;;  %v1892_v1 = vmul.f32 %v2881_v31, %v1888_v54  ;;  %p2904_p4 = pnand %p2903_p3, %p2897_p0 }
 0x978   :  { %v1891_v35 = vmul.f32 %v2883_v40, %v1887_v61 }
 0x979   :  { %v2885_v47 = vpop.eup %2884  ;;  %v1900_v30 = vadd.f32 %v1896_v29, %v1892_v1 }
 0x97a   :  { %v2887_v34 = vpop.eup %2886  ;;  %v1899_v36 = vadd.f32 %v1895_v62, %v1891_v35  ;;  %v1894_v57 = vmul.f32 %v2885_v47, %v1890_v2 }
 0x97b   :  { %v1893_v50 = vmul.f32 %v2887_v34, %v1889_v24 }
 0x97c   :  { %v2727_v41 = vpack.c.bf16 %v1900_v30, %v1899_v36  ;;  %v1902_v44 = vadd.f32 %v1898_v28, %v1894_v57 }
 0x97d   :  { %v1901_v59 = vadd.f32 %v1897_v37, %v1893_v50 }
 0x97e   :  { %2728 = vmatpush3.bf16.msra.mxu0 %v2727_v41 }
 0x97f   :  { %2729 = vmatprep.subr.bf16.mxu0 %v2921_v55  ;;  %v2730_v39 = vpack.c.bf16 %v1902_v44, %v1901_v59  ;;  %v1987_v55 = vsub.s32 0, %v1986_v26 }
 0x982   :  { %2731 = vmatpush3.bf16.msra.mxu0 %v2730_v39 }
 0x983   :  { %2645 = vmatprep.subr.mxu0 %v2923_v56 }
 0x985   :  { %2643 = vmatmul.mubr.msk.f32.vlgmr.msra.gmra.mrb[40].mxu0 %vm301_vm1, %v1904_v38 }
 0x986   :  { %2647 = vmatprep.mubr.msk.f32.mxu0 %vm2922_vm3, %v2923_v56 }
 0xa58   :  { %v1980_v25 = vpop.f32.mrb[40].mxu0 }
 0xa59   :  { %v1981_v27 = vadd.f32 %v1980_v25, %v1909_v51  ;;  %v2644_v53 = vpop.f32.mrb[41].mxu0 }
 0xa5b   :  { %v1988_v60 = vrot.slane %v1981_v27, %v1987_v55 }
 0xa5d   :  { %v1989_v42 = vsel %vm1984_vm4, %v1988_v60, -1e+30 }
 0xa5e   :  { %v1991_v49 = vsel %vm1990_vm5, %v1989_v42, -inf }
 0xa5f   :  { %1992 = vmax.xlane.f32.xlu1 %v1991_v49 }
 0xaec   :  { %v1993_v48 = vpop.xlane.xlu1 %1992 }
 0xaed   :  { %v1994_v56 = vmul.f32 %v1993_v48, %v1903_v43 }
 0xaef   :  { %v1995_v32 = vsel %vm1990_vm5, %v1994_v56, 0.0 }
 0xaf0   :  { %v1996_v3 = vrot.slane %v1995_v32, 4 }
 0xaf2   :  { %v1997_v4 = vadd.f32 %v1996_v3, %v1995_v32 }
 0xaf4   :  { %v1998_v5 = vrot.slane %v1997_v4, 2 }
 0xaf6   :  { %v1999_v6 = vadd.f32 %v1998_v5, %v1997_v4 }
 0xaf8   :  { %v2000_v7 = vrot.slane %v1999_v6, 1 }
 0xafa   :  { %v2001_v8 = vadd.f32 %v2000_v7, %v1999_v6 }
 0xafc   :  { %v2002_v9 = vsub.f32 %v1981_v27, %v2001_v8 }
 0xafe   :  { %v2003_v10 = vmul.f32 1.442695, %v2002_v9 }
 0xb00   :  { %2888 = vpow2.f32 %v2003_v10 }
 0xb0a   :  { %v2889_v11 = vpop.eup %2888 }
 0xb0b   :  { %v2008_v12 = vrot.slane %v2889_v11, %v1987_v55 }
 0xb0d   :  { %v2009_v13 = vmul.f32 %v2008_v12, %v1903_v43 }
 0xb0f   :  { %v2010_v14 = vsel %vm1990_vm5, %v2009_v13, 0.0 }
 0xb10   :  { %2011 = vadd.xlane.f32.xlu0 %v2010_v14 }
 0xb9d   :  { %v2012_v15 = vpop.xlane.xlu0 %2011 }
 0xb9e   :  { %v2013_v21 = vmul.f32 %v2012_v15, %v1903_v43 }
 0xba0   :  { %v2014_v16 = vsel %vm1990_vm5, %v2013_v21, 0.0 }
 0xba1   :  { %v2015_v17 = vrot.slane %v2014_v16, 4 }
 0xba3   :  { %v2016_v18 = vadd.f32 %v2015_v17, %v2014_v16 }
 0xba5   :  { %v2017_v33 = vrot.slane %v2016_v18, 2 }
 0xba7   :  { %v2018_v63 = vadd.f32 %v2017_v33, %v2016_v18 }
 0xba9   :  { %v2019_v46 = vrot.slane %v2018_v63, 1 }
 0xbab   :  { %v2020_v0 = vadd.f32 %v2019_v46, %v2018_v63 }
 0xbad   :  { %2890 = vrcp.f32 %v2020_v0 }
 0xbb7   :  { %v2891_v19 = vpop.eup %2890 }
 0xbb8   :  { %v2022_v20 = vmul.f32 %v2891_v19, %v2889_v11 }
 0xbba   :  { %v2026_v52 = vrot.slane %v2022_v20, %v1987_v55 }
 0xbbc   :  { %v2027_v22 = vmul.f32 %v2026_v52, %v1981_v27 }
 0xbbe   :  { %v2029_v23 = vrot.slane %v2027_v22, 1 }
 0xbc0   :  { %2646 = vmatpush3.xpose.msk.msra.mxu0 %vm407_vm2, %v2029_v23 }
 0xbc3   :  { %2648 = vmatmul.mubr.msk.f32.vlgmr.msra.gmra.mrb[42].mxu0 %vm407_vm2, %v1903_v43 }
 0xc96   :  { %v2101_v58 = vpop.f32.mrb[42].mxu0 }
 0xc97   :  { %v2106_v54 = vsel %vm2105_vm6, %v2101_v58, -inf  ;;  %v2649_v31 = vpop.f32.mrb[43].mxu0 }
 0xc98   :  { %2107 = vmax.xlane.f32.xlu0 %v2106_v54 }
 0xd25   :  { %v2108_v61 = vpop.xlane.xlu0 %2107 }
 0xd26   :  { %v2109_v40 = vsub.f32 %v2101_v58, %v2108_v61 }
 0xd28   :  { %v2110_v1 = vmul.f32 1.442695, %v2109_v40 }
 0xd2a   :  { %2892 = vpow2.f32 %v2110_v1 }
 0xd34   :  { %v2893_v29 = vpop.eup %2892 }
 0xd35   :  { %v2112_v35 = vsel %vm2105_vm6, %v2893_v29, 0.0 }
 0xd36   :  { %2113 = vadd.xlane.f32.xlu1 %v2112_v35 }
 0xdc3   :  { %v2114_v62 = vpop.xlane.xlu1 %2113 }
 0xdc4   :  { %2894 = vlog2.f32 %v2114_v62 }
 0xdce   :  { %v2895_v2 = vpop.eup %2894 }
 0xdcf   :  { %v2116_v47 = vmul.f32 0.6931472, %v2895_v2 }
 0xdd1   :  { %v2117_v30 = vsub.f32 %v2109_v40, %v2116_v47 }
 0xdd3   :  { %2118 = vst.msk [vmem:[#allocation2] sm:$0x3] %vm2105_vm6, %v2117_v30 }
 0xdd4   :  { %2907 = shalt.err (!%p2904_p4)
}
 0xdd5   :  { %s2908_s8 = scalar_lea.hbm %s3618_s13, 32 }
 0xdd6   :  { %p2909_p5 = scmp.ne.s32.totalorder %s3618_s13, %s2908_s8  ;;  %p2912_p6 = scmp.lt.u32.totalorder %s2908_s8, %s3618_s13 }
 0xdd8   :  { %p2914_p7 = pnand %p2912_p6, %p2909_p5 }
 0xdda   :  { %2917 = shalt.err (!%p2914_p7)
}
 0xddb   :  { %2128 = dma.vmem_to_hbm [thread:$0]  %s2126_s12, 32, %s3618_s13, [#allocation3]  }
 0xddc   :  { %2918 = dma.done.wait [#allocation3], 32  }
 0xddd   :  { %2919 = vsyncadd [#allocation3], 4294967264 }
 0xdde   :  { %2132 = vsyncpa [#allocation3], 1 }

</bundles_post_ra>
